<compile_context>
chip_gen: v7x
topology: tpu7x:2x2x1
jax: 0.10.0
libtpu: 0.0.40
codegen_flags: <defaults>
</compile_context>

<pallas_src>
import functools

import jax
import jax.numpy as jnp
from jax.experimental import pallas as pl
from jax.experimental.pallas import tpu as pltpu

LANE = 128   # lane width: pad feature dims to a multiple of this
ROW_PAD = 256  # node-count padding granularity (so 256/512/1024 tiles divide it)


def _round_up(x, m):
    return ((x + m - 1) // m) * m


def _pad_to(x, shape):
    return jnp.pad(x, [(0, s - d) for d, s in zip(x.shape, shape)])


def _pick_tile(n, candidates):
    for t in candidates:
        if t <= n and n % t == 0:
            return t
    return n


def _vmem_budget_bytes():
    # ~75% of physical VMEM: v7x 64 MiB -> 48 MiB, v5e/v6e 128 MiB -> 96 MiB.
    try:
        cap = pltpu.get_tpu_info().vmem_capacity_bytes
    except Exception:
        cap = 64 * 1024 * 1024
    return int(cap) * 3 // 4


# ----------------------------- kernels --------------------------------------

def xw_kernel(x_ref, w_ref, o_ref, acc_ref):
    # Feature transform X @ W (row-tiled, K-reduction grid axis).
    k = pl.program_id(1)

    @pl.when(k == 0)
    def _():
        acc_ref[...] = jnp.zeros_like(acc_ref)

    acc_ref[...] += jnp.dot(
        x_ref[...], w_ref[...], preferred_element_type=jnp.float32
    )

    @pl.when(k == pl.num_programs(1) - 1)
    def _():
        o_ref[...] = acc_ref[...].astype(o_ref.dtype)


def agg_kernel_resident(a_ref, xw_ref, b_ref, o_ref, acc_ref, *, tk):
    # A_hat @ XW with XW fully VMEM-resident (loaded once via constant index_map).
    # Bias folded into the accumulator init; epilogue is ReLU + cast + store only.
    k = pl.program_id(1)

    @pl.when(k == 0)
    def _():
        acc_ref[...] = jnp.broadcast_to(b_ref[...], acc_ref.shape)

    k_off = pl.multiple_of(k * tk, tk)
    acc_ref[...] += jnp.dot(
        a_ref[...], xw_ref[pl.ds(k_off, tk), :],
        preferred_element_type=jnp.float32,
    )

    @pl.when(k == pl.num_programs(1) - 1)
    def _():
        o_ref[...] = jnp.maximum(acc_ref[...], 0.0).astype(o_ref.dtype)


def agg_kernel_streamed(a_ref, xw_ref, b_ref, o_ref, acc_ref):
    # Fallback: XW streamed per K tile (used only if resident XW exceeds VMEM).
    k = pl.program_id(1)

    @pl.when(k == 0)
    def _():
        acc_ref[...] = jnp.broadcast_to(b_ref[...], acc_ref.shape)

    acc_ref[...] += jnp.dot(
        a_ref[...], xw_ref[...], preferred_element_type=jnp.float32
    )

    @pl.when(k == pl.num_programs(1) - 1)
    def _():
        o_ref[...] = jnp.maximum(acc_ref[...], 0.0).astype(o_ref.dtype)


# --------------------------- layer wrapper -----------------------------------

def gcn_layer(a_pad_bf16, x, w, b, *, out_dtype):
    """relu(A_hat @ (X @ W) + b) on padded inputs.

    a_pad_bf16 : [n_pad, n_pad] bf16 (n_pad multiple of ROW_PAD, built once upstream)
    x          : [n or n_pad, d] features (pad rows/cols beyond w are zero-safe)
    w, b       : unpadded layer weights
    returns    : [n_pad, round_up(d_out, LANE)] padded output (pad cols are zero)
    """
    n_pad = a_pad_bf16.shape[0]
    d_in, d_out = w.shape
    dout_pad = _round_up(d_out, LANE)
    out_itemsize = jnp.dtype(out_dtype).itemsize
    budget = _vmem_budget_bytes()

    # ---- stage 1: XW = X @ W (computed once, lane-dense bf16 output) --------
    din_pad = _round_up(max(d_in, x.shape[1]), LANE)
    if din_pad > 2048:
        tk_in = 2048                      # K-tile very large feature dims
        din_pad = _round_up(din_pad, tk_in)
    else:
        tk_in = din_pad
    tm_x = _pick_tile(n_pad, (512, 256))

    x_p = _pad_to(x, (n_pad, din_pad)).astype(jnp.bfloat16)
    w_p = _pad_to(w, (din_pad, dout_pad)).astype(jnp.bfloat16)
    b_p = _pad_to(b.reshape(1, d_out).astype(jnp.float32), (1, dout_pad))

    xw = pl.pallas_call(
        xw_kernel,
        out_shape=jax.ShapeDtypeStruct((n_pad, dout_pad), jnp.bfloat16),
        grid=(n_pad // tm_x, din_pad // tk_in),
        in_specs=[
            pl.BlockSpec((tm_x, tk_in), lambda i, k: (i, k)),
            pl.BlockSpec((tk_in, dout_pad), lambda i, k: (k, 0)),
        ],
        out_specs=pl.BlockSpec((tm_x, dout_pad), lambda i, k: (i, 0)),
        scratch_shapes=[pltpu.VMEM((tm_x, dout_pad), jnp.float32)],
        compiler_params=pltpu.CompilerParams(
            dimension_semantics=("parallel", "arbitrary"),
            vmem_limit_bytes=budget,
        ),
    )(x_p, w_p)

    # ---- stage 2: tiled A_hat @ XW with K reduction + fused epilogue --------
    tm = _pick_tile(n_pad, (1024, 512, 256))
    while n_pad // tm < 4 and tm > 256:
        tm //= 2                          # keep >=4 row tiles for v7x's 2 TCs
    tk = _pick_tile(n_pad, (2048, 1024, 512, 256))

    # VMEM footprint with a fully resident XW (conservative x2 buffering).
    resident_fp = (tm * tk * 2 * 2                    # A_hat tile (bf16)
                   + n_pad * dout_pad * 2 * 2         # resident XW (bf16)
                   + tm * dout_pad * 4                # f32 accumulator
                   + tm * dout_pad * out_itemsize * 2 # output tile
                   + dout_pad * 4 * 2)                # bias
    xw_resident = resident_fp <= budget

    if xw_resident:
        kernel = functools.partial(agg_kernel_resident, tk=tk)
        xw_spec = pl.BlockSpec((n_pad, dout_pad), lambda i, k: (0, 0))
        xw_bytes = n_pad * dout_pad * 2
    else:
        kernel = agg_kernel_streamed
        xw_spec = pl.BlockSpec((tk, dout_pad), lambda i, k: (k, 0))
        xw_bytes = (n_pad // tm) * n_pad * dout_pad * 2

    cost = pl.CostEstimate(
        flops=2 * n_pad * n_pad * dout_pad,
        transcendentals=0,
        bytes_accessed=(n_pad * n_pad * 2              # A_hat stream (bf16)
                        + xw_bytes                      # XW
                        + n_pad * dout_pad * out_itemsize
                        + dout_pad * 4),
    )
    out_p = pl.pallas_call(
        kernel,
        out_shape=jax.ShapeDtypeStruct((n_pad, dout_pad), out_dtype),
        grid=(n_pad // tm, n_pad // tk),
        in_specs=[
            pl.BlockSpec((tm, tk), lambda i, k: (i, k)),   # A_hat tile
            xw_spec,                                       # XW (resident or streamed)
            pl.BlockSpec((1, dout_pad), lambda i, k: (0, 0)),  # bias (resident)
        ],
        out_specs=pl.BlockSpec((tm, dout_pad), lambda i, k: (i, 0)),
        scratch_shapes=[pltpu.VMEM((tm, dout_pad), jnp.float32)],
        compiler_params=pltpu.CompilerParams(
            dimension_semantics=("parallel", "arbitrary"),
            vmem_limit_bytes=budget,
        ),
        cost_estimate=cost,
    )(a_pad_bf16, xw, b_p)
    return out_p


# --------------------------- model forward -----------------------------------

def build_norm_adj_padded(edge_index, num_nodes, n_pad):
    """Dense D^{-1/2}(A+I)D^{-1/2} built directly at padded size, fused cast.

    Pad rows/cols have zero degree -> zero rows/cols in A_hat, so padded nodes
    never contribute to aggregation.  Duplicate edges are counted twice,
    matching PyG GCNConv with unit edge weights.
    """
    src = edge_index[0]
    dst = edge_index[1]
    loops = jnp.arange(num_nodes, dtype=edge_index.dtype)
    src = jnp.concatenate([src, loops])
    dst = jnp.concatenate([dst, loops])
    adj = jnp.zeros((n_pad, n_pad), jnp.float32).at[dst, src].add(1.0)
    deg = adj.sum(axis=1)
    dinv = jnp.where(deg > 0, jax.lax.rsqrt(deg), 0.0)
    # Fused normalize + bf16 cast: one O(N^2) read + one O(N^2) write.
    return (adj * dinv[:, None] * dinv[None, :]).astype(jnp.bfloat16)


def csgcl_forward(x, edge_index, params):
    """CSGCL.forward: the 2-layer GCN encoder (skip=False, k=2, ReLU)."""
    n = x.shape[0]
    d_out = params["w2"].shape[1]
    n_pad = _round_up(n, ROW_PAD)

    # Build + normalize + cast A_hat once; both layers stream the same bf16 copy.
    # NOTE: bf16 A_hat keeps ~3 significant digits on the normalization weights;
    # f32 accumulation keeps end-to-end error well inside the test tolerance.
    a_pad = build_norm_adj_padded(edge_index, n, n_pad)

    h = gcn_layer(a_pad, x.astype(jnp.float32), params["w1"], params["b1"],
                  out_dtype=jnp.bfloat16)                 # in -> 2*out
    h = gcn_layer(a_pad, h, params["w2"], params["b2"],
                  out_dtype=jnp.float32)                  # 2*out -> out
    return h[:n, :d_out]


def csgcl_reference(x, edge_index, params):
    """Pure-JAX f32 reference for validation."""
    n = x.shape[0]
    src, dst = edge_index[0], edge_index[1]
    loops = jnp.arange(n, dtype=edge_index.dtype)
    src = jnp.concatenate([src, loops])
    dst = jnp.concatenate([dst, loops])
    adj = jnp.zeros((n, n), jnp.float32).at[dst, src].add(1.0)
    deg = adj.sum(axis=1)
    dinv = jnp.where(deg > 0, 1.0 / jnp.sqrt(deg), 0.0)
    a_hat = adj * dinv[:, None] * dinv[None, :]
    h = jnp.maximum(a_hat @ (x @ params["w1"]) + params["b1"], 0.0)
    h = jnp.maximum(a_hat @ (h @ params["w2"]) + params["b2"], 0.0)
    return h


def init_params(key, in_channels, out_channels):
    hid = 2 * out_channels
    k1, k2 = jax.random.split(key)
    w1 = jax.random.normal(k1, (in_channels, hid), jnp.float32) * (
        1.0 / jnp.sqrt(in_channels))
    w2 = jax.random.normal(k2, (hid, out_channels), jnp.float32) * (
        1.0 / jnp.sqrt(hid))
    b1 = jnp.zeros((hid,), jnp.float32)
    b2 = jnp.zeros((out_channels,), jnp.float32)
    # TODO(synk): fc1/fc2 projection heads exist in CSGCL.__init__ but are not
    # used by forward(); they are omitted here.
    return {"w1": w1, "b1": b1, "w2": w2, "b2": b2}


if __name__ == "__main__":
    key = jax.random.PRNGKey(0)
    k_x, k_e, k_p = jax.random.split(key, 3)

    num_nodes = 16
    in_channels = 16       # input feature dim
    out_channels = 32      # num_hidden (encoder output dim); hidden layer = 64
    num_edges = 40

    x = jax.random.normal(k_x, (num_nodes, in_channels), jnp.float32)
    edge_index = jax.random.randint(
        k_e, (2, num_edges), 0, num_nodes, dtype=jnp.int32)

    params = init_params(k_p, in_channels, out_channels)

    out = jax.jit(csgcl_forward)(x, edge_index, params)
    out = jax.block_until_ready(out)

    assert out.shape == (num_nodes, out_channels)
    assert bool(jnp.all(jnp.isfinite(out)))

    # Loose tolerance: kernel path streams bf16 operands (f32 accumulation).
    ref = csgcl_reference(x, edge_index, params)
    max_err = float(jnp.max(jnp.abs(out - ref)))
    assert max_err < 0.25, f"max abs error {max_err}"

    print("KERNEL_OK")
</pallas_src>

<mosaic_0001>
module attributes {stable_mosaic.version = 11 : i64} {
  func.func @xw_kernel(%arg0: i32, %arg1: i32, %arg2: memref<256x128xbf16, #tpu.memory_space<vmem>>, %arg3: memref<128x128xbf16, #tpu.memory_space<vmem>>, %arg4: memref<256x128xbf16, #tpu.memory_space<vmem>>, %arg5: memref<256x128xf32, #tpu.memory_space<vmem>>) attributes {dimension_semantics = [#tpu.dimension_semantics<parallel>, #tpu.dimension_semantics<arbitrary>], iteration_bounds = array<i64: 1, 1>, scalar_prefetch = 0 : i64, scratch_operands = 1 : i64, tpu.core_type = #tpu.core_type<tc>, window_params = [{transform_indices = @transform_0, window_bounds = array<i64: 256, 128>}, {transform_indices = @transform_1, window_bounds = array<i64: 128, 128>}, {transform_indices = @transform_2, window_bounds = array<i64: 256, 128>}]} {
    %c0_i32 = arith.constant 0 : i32
    %0 = arith.cmpi eq, %arg1, %c0_i32 : i32
    %1 = arith.extui %0 : i1 to i32
    %c0_i32_0 = arith.constant 0 : i32
    %2 = arith.cmpi ne, %1, %c0_i32_0 : i32
    scf.if %2 {
      %cst_10 = arith.constant 0.000000e+00 : f32
      %12 = vector.broadcast %cst_10 : f32 to vector<256x128xf32>
      %c0_11 = arith.constant 0 : index
      %c0_12 = arith.constant 0 : index
      %13 = vector.load %arg5[%c0_11, %c0_12] : memref<256x128xf32, #tpu.memory_space<vmem>>, vector<256x128xf32>
      tpu.vector_store %arg5[%c0_11, %c0_12], %12 {strides = array<i32>} : memref<256x128xf32, #tpu.memory_space<vmem>>, vector<256x128xf32>,
    } else {
    }
    %c0 = arith.constant 0 : index
    %c0_1 = arith.constant 0 : index
    %3 = vector.load %arg5[%c0, %c0_1] : memref<256x128xf32, #tpu.memory_space<vmem>>, vector<256x128xf32>
    %c0_2 = arith.constant 0 : index
    %c0_3 = arith.constant 0 : index
    %4 = vector.load %arg2[%c0_2, %c0_3] : memref<256x128xbf16, #tpu.memory_space<vmem>>, vector<256x128xbf16>
    %c0_4 = arith.constant 0 : index
    %c0_5 = arith.constant 0 : index
    %5 = vector.load %arg3[%c0_4, %c0_5] : memref<128x128xbf16, #tpu.memory_space<vmem>>, vector<128x128xbf16>
    %cst = arith.constant dense<0.000000e+00> : vector<256x128xf32>
    %6 = tpu.matmul %4, %5, %cst {dimension_numbers = #tpu.dot_dimension_numbers<[1], [0], [0], [1], [0, 0, 1, 1], [], []>} : vector<256x128xbf16>, vector<128x128xbf16>, vector<256x128xf32> -> vector<256x128xf32>
    %7 = arith.addf %3, %6 : vector<256x128xf32>
    %c0_6 = arith.constant 0 : index
    %c0_7 = arith.constant 0 : index
    %8 = vector.load %arg5[%c0_6, %c0_7] : memref<256x128xf32, #tpu.memory_space<vmem>>, vector<256x128xf32>
    tpu.vector_store %arg5[%c0_6, %c0_7], %7 {strides = array<i32>} : memref<256x128xf32, #tpu.memory_space<vmem>>, vector<256x128xf32>,
    %c0_i32_8 = arith.constant 0 : i32
    %9 = arith.cmpi eq, %arg1, %c0_i32_8 : i32
    %10 = arith.extui %9 : i1 to i32
    %c0_i32_9 = arith.constant 0 : i32
    %11 = arith.cmpi ne, %10, %c0_i32_9 : i32
    scf.if %11 {
      %c0_10 = arith.constant 0 : index
      %c0_11 = arith.constant 0 : index
      %12 = vector.load %arg5[%c0_10, %c0_11] : memref<256x128xf32, #tpu.memory_space<vmem>>, vector<256x128xf32>
      %13 = arith.truncf %12 : vector<256x128xf32> to vector<256x128xbf16>
      %c0_12 = arith.constant 0 : index
      %c0_13 = arith.constant 0 : index
      %14 = vector.load %arg4[%c0_12, %c0_13] : memref<256x128xbf16, #tpu.memory_space<vmem>>, vector<256x128xbf16>
      tpu.vector_store %arg4[%c0_12, %c0_13], %13 {strides = array<i32>} : memref<256x128xbf16, #tpu.memory_space<vmem>>, vector<256x128xbf16>,
    } else {
    }
    return
  }
  func.func @transform_0(%arg0: i32, %arg1: i32) -> (i32, i32) {
    %c0_i32 = arith.constant 0 : i32
    return %arg0, %arg1 : i32, i32
  }
  func.func @transform_1(%arg0: i32, %arg1: i32) -> (i32, i32) {
    %c0_i32 = arith.constant 0 : i32
    %c0_i32_0 = arith.constant 0 : i32
    return %arg1, %c0_i32 : i32, i32
  }
  func.func @transform_2(%arg0: i32, %arg1: i32) -> (i32, i32) {
    %c0_i32 = arith.constant 0 : i32
    %c0_i32_0 = arith.constant 0 : i32
    return %arg0, %c0_i32 : i32, i32
  }
}

module attributes {stable_mosaic.version = 11 : i64} {
  func.func @agg_kernel_resident(%arg0: i32, %arg1: i32, %arg2: memref<256x256xbf16, #tpu.memory_space<vmem>>, %arg3: memref<256x128xbf16, #tpu.memory_space<vmem>>, %arg4: memref<1x128xf32, #tpu.memory_space<vmem>>, %arg5: memref<256x128xbf16, #tpu.memory_space<vmem>>, %arg6: memref<256x128xf32, #tpu.memory_space<vmem>>) attributes {dimension_semantics = [#tpu.dimension_semantics<parallel>, #tpu.dimension_semantics<arbitrary>], iteration_bounds = array<i64: 1, 1>, scalar_prefetch = 0 : i64, scratch_operands = 1 : i64, tpu.core_type = #tpu.core_type<tc>, window_params = [{transform_indices = @transform_0, window_bounds = array<i64: 256, 256>}, {pipeline_mode = #tpu.pipeline_mode<synchronous>, transform_indices = @transform_1, window_bounds = array<i64: 256, 128>}, {pipeline_mode = #tpu.pipeline_mode<synchronous>, transform_indices = @transform_2, window_bounds = array<i64: 1, 128>}, {transform_indices = @transform_3, window_bounds = array<i64: 256, 128>}]} {
    %c0_i32 = arith.constant 0 : i32
    %0 = arith.cmpi eq, %arg1, %c0_i32 : i32
    %1 = arith.extui %0 : i1 to i32
    %c0_i32_0 = arith.constant 0 : i32
    %2 = arith.cmpi ne, %1, %c0_i32_0 : i32
    scf.if %2 {
      %c0_9 = arith.constant 0 : index
      %c0_10 = arith.constant 0 : index
      %15 = vector.load %arg4[%c0_9, %c0_10] : memref<1x128xf32, #tpu.memory_space<vmem>>, vector<1x128xf32>
      %16 = vector.shape_cast %15 : vector<1x128xf32> to vector<1x128xf32>
      %17 = vector.broadcast %16 : vector<1x128xf32> to vector<256x128xf32>
      %c0_11 = arith.constant 0 : index
      %c0_12 = arith.constant 0 : index
      %18 = vector.load %arg6[%c0_11, %c0_12] : memref<256x128xf32, #tpu.memory_space<vmem>>, vector<256x128xf32>
      tpu.vector_store %arg6[%c0_11, %c0_12], %17 {strides = array<i32>} : memref<256x128xf32, #tpu.memory_space<vmem>>, vector<256x128xf32>,
    } else {
    }
    %c256_i32 = arith.constant 256 : i32
    %3 = arith.muli %arg1, %c256_i32 : i32
    %4 = tpu.assume_multiple %3, 256 : i32
    %c0 = arith.constant 0 : index
    %c0_1 = arith.constant 0 : index
    %5 = vector.load %arg6[%c0, %c0_1] : memref<256x128xf32, #tpu.memory_space<vmem>>, vector<256x128xf32>
    %c0_2 = arith.constant 0 : index
    %c0_3 = arith.constant 0 : index
    %6 = vector.load %arg2[%c0_2, %c0_3] : memref<256x256xbf16, #tpu.memory_space<vmem>>, vector<256x256xbf16>
    %7 = arith.index_cast %4 : i32 to index
    %c0_4 = arith.constant 0 : index
    %8 = vector.load %arg3[%7, %c0_4] : memref<256x128xbf16, #tpu.memory_space<vmem>>, vector<256x128xbf16>
    %cst = arith.constant dense<0.000000e+00> : vector<256x128xf32>
    %9 = tpu.matmul %6, %8, %cst {dimension_numbers = #tpu.dot_dimension_numbers<[1], [0], [0], [1], [0, 0, 1, 1], [], []>} : vector<256x256xbf16>, vector<256x128xbf16>, vector<256x128xf32> -> vector<256x128xf32>
    %10 = arith.addf %5, %9 : vector<256x128xf32>
    %c0_5 = arith.constant 0 : index
    %c0_6 = arith.constant 0 : index
    %11 = vector.load %arg6[%c0_5, %c0_6] : memref<256x128xf32, #tpu.memory_space<vmem>>, vector<256x128xf32>
    tpu.vector_store %arg6[%c0_5, %c0_6], %10 {strides = array<i32>} : memref<256x128xf32, #tpu.memory_space<vmem>>, vector<256x128xf32>,
    %c0_i32_7 = arith.constant 0 : i32
    %12 = arith.cmpi eq, %arg1, %c0_i32_7 : i32
    %13 = arith.extui %12 : i1 to i32
    %c0_i32_8 = arith.constant 0 : i32
    %14 = arith.cmpi ne, %13, %c0_i32_8 : i32
    scf.if %14 {
      %c0_9 = arith.constant 0 : index
      %c0_10 = arith.constant 0 : index
      %15 = vector.load %arg6[%c0_9, %c0_10] : memref<256x128xf32, #tpu.memory_space<vmem>>, vector<256x128xf32>
      %cst_11 = arith.constant 0.000000e+00 : f32
      %16 = vector.broadcast %cst_11 : f32 to vector<256x128xf32>
      %17 = arith.maximumf %15, %16 : vector<256x128xf32>
      %18 = arith.truncf %17 : vector<256x128xf32> to vector<256x128xbf16>
      %c0_12 = arith.constant 0 : index
      %c0_13 = arith.constant 0 : index
      %19 = vector.load %arg5[%c0_12, %c0_13] : memref<256x128xbf16, #tpu.memory_space<vmem>>, vector<256x128xbf16>
      tpu.vector_store %arg5[%c0_12, %c0_13], %18 {strides = array<i32>} : memref<256x128xbf16, #tpu.memory_space<vmem>>, vector<256x128xbf16>,
    } else {
    }
    return
  }
  func.func @transform_0(%arg0: i32, %arg1: i32) -> (i32, i32) {
    %c0_i32 = arith.constant 0 : i32
    return %arg0, %arg1 : i32, i32
  }
  func.func @transform_1(%arg0: i32, %arg1: i32) -> (i32, i32) {
    %c0_i32 = arith.constant 0 : i32
    %c0_i32_0 = arith.constant 0 : i32
    %c0_i32_1 = arith.constant 0 : i32
    return %c0_i32, %c0_i32_0 : i32, i32
  }
  func.func @transform_2(%arg0: i32, %arg1: i32) -> (i32, i32) {
    %c0_i32 = arith.constant 0 : i32
    %c0_i32_0 = arith.constant 0 : i32
    %c0_i32_1 = arith.constant 0 : i32
    return %c0_i32, %c0_i32_0 : i32, i32
  }
  func.func @transform_3(%arg0: i32, %arg1: i32) -> (i32, i32) {
    %c0_i32 = arith.constant 0 : i32
    %c0_i32_0 = arith.constant 0 : i32
    return %arg0, %c0_i32 : i32, i32
  }
}

module attributes {stable_mosaic.version = 11 : i64} {
  func.func @agg_kernel_resident(%arg0: i32, %arg1: i32, %arg2: memref<256x256xbf16, #tpu.memory_space<vmem>>, %arg3: memref<256x128xbf16, #tpu.memory_space<vmem>>, %arg4: memref<1x128xf32, #tpu.memory_space<vmem>>, %arg5: memref<256x128xf32, #tpu.memory_space<vmem>>, %arg6: memref<256x128xf32, #tpu.memory_space<vmem>>) attributes {dimension_semantics = [#tpu.dimension_semantics<parallel>, #tpu.dimension_semantics<arbitrary>], iteration_bounds = array<i64: 1, 1>, scalar_prefetch = 0 : i64, scratch_operands = 1 : i64, tpu.core_type = #tpu.core_type<tc>, window_params = [{transform_indices = @transform_0, window_bounds = array<i64: 256, 256>}, {pipeline_mode = #tpu.pipeline_mode<synchronous>, transform_indices = @transform_1, window_bounds = array<i64: 256, 128>}, {pipeline_mode = #tpu.pipeline_mode<synchronous>, transform_indices = @transform_2, window_bounds = array<i64: 1, 128>}, {transform_indices = @transform_3, window_bounds = array<i64: 256, 128>}]} {
    %c0_i32 = arith.constant 0 : i32
    %0 = arith.cmpi eq, %arg1, %c0_i32 : i32
    %1 = arith.extui %0 : i1 to i32
    %c0_i32_0 = arith.constant 0 : i32
    %2 = arith.cmpi ne, %1, %c0_i32_0 : i32
    scf.if %2 {
      %c0_9 = arith.constant 0 : index
      %c0_10 = arith.constant 0 : index
      %15 = vector.load %arg4[%c0_9, %c0_10] : memref<1x128xf32, #tpu.memory_space<vmem>>, vector<1x128xf32>
      %16 = vector.shape_cast %15 : vector<1x128xf32> to vector<1x128xf32>
      %17 = vector.broadcast %16 : vector<1x128xf32> to vector<256x128xf32>
      %c0_11 = arith.constant 0 : index
      %c0_12 = arith.constant 0 : index
      %18 = vector.load %arg6[%c0_11, %c0_12] : memref<256x128xf32, #tpu.memory_space<vmem>>, vector<256x128xf32>
      tpu.vector_store %arg6[%c0_11, %c0_12], %17 {strides = array<i32>} : memref<256x128xf32, #tpu.memory_space<vmem>>, vector<256x128xf32>,
    } else {
    }
    %c256_i32 = arith.constant 256 : i32
    %3 = arith.muli %arg1, %c256_i32 : i32
    %4 = tpu.assume_multiple %3, 256 : i32
    %c0 = arith.constant 0 : index
    %c0_1 = arith.constant 0 : index
    %5 = vector.load %arg6[%c0, %c0_1] : memref<256x128xf32, #tpu.memory_space<vmem>>, vector<256x128xf32>
    %c0_2 = arith.constant 0 : index
    %c0_3 = arith.constant 0 : index
    %6 = vector.load %arg2[%c0_2, %c0_3] : memref<256x256xbf16, #tpu.memory_space<vmem>>, vector<256x256xbf16>
    %7 = arith.index_cast %4 : i32 to index
    %c0_4 = arith.constant 0 : index
    %8 = vector.load %arg3[%7, %c0_4] : memref<256x128xbf16, #tpu.memory_space<vmem>>, vector<256x128xbf16>
    %cst = arith.constant dense<0.000000e+00> : vector<256x128xf32>
    %9 = tpu.matmul %6, %8, %cst {dimension_numbers = #tpu.dot_dimension_numbers<[1], [0], [0], [1], [0, 0, 1, 1], [], []>} : vector<256x256xbf16>, vector<256x128xbf16>, vector<256x128xf32> -> vector<256x128xf32>
    %10 = arith.addf %5, %9 : vector<256x128xf32>
    %c0_5 = arith.constant 0 : index
    %c0_6 = arith.constant 0 : index
    %11 = vector.load %arg6[%c0_5, %c0_6] : memref<256x128xf32, #tpu.memory_space<vmem>>, vector<256x128xf32>
    tpu.vector_store %arg6[%c0_5, %c0_6], %10 {strides = array<i32>} : memref<256x128xf32, #tpu.memory_space<vmem>>, vector<256x128xf32>,
    %c0_i32_7 = arith.constant 0 : i32
    %12 = arith.cmpi eq, %arg1, %c0_i32_7 : i32
    %13 = arith.extui %12 : i1 to i32
    %c0_i32_8 = arith.constant 0 : i32
    %14 = arith.cmpi ne, %13, %c0_i32_8 : i32
    scf.if %14 {
      %c0_9 = arith.constant 0 : index
      %c0_10 = arith.constant 0 : index
      %15 = vector.load %arg6[%c0_9, %c0_10] : memref<256x128xf32, #tpu.memory_space<vmem>>, vector<256x128xf32>
      %cst_11 = arith.constant 0.000000e+00 : f32
      %16 = vector.broadcast %cst_11 : f32 to vector<256x128xf32>
      %17 = arith.maximumf %15, %16 : vector<256x128xf32>
      %c0_12 = arith.constant 0 : index
      %c0_13 = arith.constant 0 : index
      %18 = vector.load %arg5[%c0_12, %c0_13] : memref<256x128xf32, #tpu.memory_space<vmem>>, vector<256x128xf32>
      tpu.vector_store %arg5[%c0_12, %c0_13], %17 {strides = array<i32>} : memref<256x128xf32, #tpu.memory_space<vmem>>, vector<256x128xf32>,
    } else {
    }
    return
  }
  func.func @transform_0(%arg0: i32, %arg1: i32) -> (i32, i32) {
    %c0_i32 = arith.constant 0 : i32
    return %arg0, %arg1 : i32, i32
  }
  func.func @transform_1(%arg0: i32, %arg1: i32) -> (i32, i32) {
    %c0_i32 = arith.constant 0 : i32
    %c0_i32_0 = arith.constant 0 : i32
    %c0_i32_1 = arith.constant 0 : i32
    return %c0_i32, %c0_i32_0 : i32, i32
  }
  func.func @transform_2(%arg0: i32, %arg1: i32) -> (i32, i32) {
    %c0_i32 = arith.constant 0 : i32
    %c0_i32_0 = arith.constant 0 : i32
    %c0_i32_1 = arith.constant 0 : i32
    return %c0_i32, %c0_i32_0 : i32, i32
  }
  func.func @transform_3(%arg0: i32, %arg1: i32) -> (i32, i32) {
    %c0_i32 = arith.constant 0 : i32
    %c0_i32_0 = arith.constant 0 : i32
    return %arg0, %c0_i32 : i32, i32
  }
}

</mosaic_0001>

<bundles_post_ra>
// kernel: csgcl_forward.4
= control target key start
LH: loop header
LB: loop body
LE: loop exit
PB: predicated region body
PF: predicated region fallthrough
CT: control target
= control target key end

     0   :  { %s1126_s1 = inlined_call_operand.vmem [shape: bf16[128,128], index: 1, kind: input, shape index: {}]   ;;  %s1127_s0 = inlined_call_operand.vmem [shape: bf16[256,128], index: 0, kind: input, shape index: {}]   ;;  %s1128_s2 = inlined_call_operand.vmem [shape: bf16[256,128], index: 2, kind: output, shape index: {}]  }
   0x1   :  { %v967_v0 = vld [vmem:[%s1126_s1] sm:$0xff]   ;;  %v968_v1 = vld [vmem:[%s1126_s1 + $0x8] sm:$0xff]   ;;  %v969_v2 = vld [vmem:[%s1126_s1 + $0x10] sm:$0xff]  }
   0x2   :  { %903 = vmatprep.subr.bf16.mxu0 %v967_v0  ;;  %951 = vmatprep.subr.bf16.mxu1 %v967_v0  ;;  %v970_v3 = vld [vmem:[%s1126_s1 + $0x18] sm:$0xff]   ;;  %v975_v4 = vld [vmem:[%s1127_s0] sm:$0xff]   ;;  %v972_v7 = vld [vmem:[%s1126_s1 + $0x28] sm:$0xff]  }
   0x3   :  { %904 = vmatpush3.bf16.msra.mxu0 %v967_v0  ;;  %959 = vmatpush3.bf16.msra.mxu1 %v967_v0  ;;  %v976_v5 = vld [vmem:[%s1127_s0 + $0x40] sm:$0xff]   ;;  %v973_v8 = vld [vmem:[%s1126_s1 + $0x30] sm:$0xff]   ;;  %v974_v9 = vld [vmem:[%s1126_s1 + $0x38] sm:$0xff]  }
   0x4   :  { %905 = vmatprep.subr.bf16.mxu0 %v968_v1  ;;  %952 = vmatprep.subr.bf16.mxu1 %v968_v1  ;;  %v971_v6 = vld [vmem:[%s1126_s1 + $0x20] sm:$0xff]   ;;  %v977_v10 = vld [vmem:[%s1127_s0 + $0x8] sm:$0xff]   ;;  %v979_v12 = vld [vmem:[%s1127_s0 + $0x10] sm:$0xff]  }
   0x5   :  { %919 = vmatprep.mubr.bf16.mxu0 %v975_v4  ;;  %935 = vmatprep.mubr.bf16.mxu1 %v976_v5  ;;  %v978_v11 = vld [vmem:[%s1127_s0 + $0x48] sm:$0xff]   ;;  %v980_v13 = vld [vmem:[%s1127_s0 + $0x50] sm:$0xff]   ;;  %v981_v14 = vld [vmem:[%s1127_s0 + $0x18] sm:$0xff]  }
   0x6   :  { %v982_v15 = vld [vmem:[%s1127_s0 + $0x58] sm:$0xff]   ;;  %v983_v16 = vld [vmem:[%s1127_s0 + $0x20] sm:$0xff]   ;;  %v985_v18 = vld [vmem:[%s1127_s0 + $0x28] sm:$0xff]  }
   0x7   :  { %906 = vmatpush3.bf16.msra.mxu0 %v968_v1  ;;  %960 = vmatpush3.bf16.msra.mxu1 %v968_v1  ;;  %v984_v17 = vld [vmem:[%s1127_s0 + $0x60] sm:$0xff]   ;;  %v986_v19 = vld [vmem:[%s1127_s0 + $0x68] sm:$0xff]   ;;  %v987_v20 = vld [vmem:[%s1127_s0 + $0x30] sm:$0xff]  }
   0x8   :  { %907 = vmatprep.subr.bf16.mxu0 %v969_v2  ;;  %953 = vmatprep.subr.bf16.mxu1 %v969_v2  ;;  %v988_v21 = vld [vmem:[%s1127_s0 + $0x70] sm:$0xff]   ;;  %v989_v22 = vld [vmem:[%s1127_s0 + $0x38] sm:$0xff]  }
   0x9   :  { %v990_v23 = vld [vmem:[%s1127_s0 + $0x78] sm:$0xff]  }
   0xb   :  { %908 = vmatpush3.bf16.msra.mxu0 %v969_v2  ;;  %961 = vmatpush3.bf16.msra.mxu1 %v969_v2 }
   0xc   :  { %909 = vmatprep.subr.bf16.mxu0 %v970_v3  ;;  %954 = vmatprep.subr.bf16.mxu1 %v970_v3 }
   0xf   :  { %910 = vmatpush3.bf16.msra.mxu0 %v970_v3  ;;  %962 = vmatpush3.bf16.msra.mxu1 %v970_v3 }
  0x10   :  { %911 = vmatprep.subr.bf16.mxu0 %v971_v6  ;;  %955 = vmatprep.subr.bf16.mxu1 %v971_v6 }
  0x13   :  { %912 = vmatpush3.bf16.msra.mxu0 %v971_v6  ;;  %963 = vmatpush3.bf16.msra.mxu1 %v971_v6 }
  0x14   :  { %913 = vmatprep.subr.bf16.mxu0 %v972_v7  ;;  %956 = vmatprep.subr.bf16.mxu1 %v972_v7 }
  0x17   :  { %914 = vmatpush3.bf16.msra.mxu0 %v972_v7  ;;  %964 = vmatpush3.bf16.msra.mxu1 %v972_v7 }
  0x18   :  { %915 = vmatprep.subr.bf16.mxu0 %v973_v8  ;;  %957 = vmatprep.subr.bf16.mxu1 %v973_v8 }
  0x1b   :  { %916 = vmatpush3.bf16.msra.mxu0 %v973_v8  ;;  %965 = vmatpush3.bf16.msra.mxu1 %v973_v8 }
  0x1c   :  { %917 = vmatprep.subr.bf16.mxu0 %v974_v9  ;;  %958 = vmatprep.subr.bf16.mxu1 %v974_v9 }
  0x1f   :  { %918 = vmatpush3.bf16.msra.mxu0 %v974_v9  ;;  %966 = vmatpush3.bf16.msra.mxu1 %v974_v9 }
  0x22   :  { %920 = vmatmul.mubr.bf16.vlgmr.msra.gmra.mrb[0].mxu0 %v977_v10  ;;  %936 = vmatmul.mubr.bf16.vlgmr.msra.gmra.mrb[0].mxu1 %v978_v11 }
  0x23   :  { %923 = vmatprep.mubr.bf16.mxu0 %v979_v12  ;;  %939 = vmatprep.mubr.bf16.mxu1 %v980_v13 }
  0x2a   :  { %924 = vmatmul.mubr.bf16.gmra.mrb[4].mxu0 %v981_v14  ;;  %940 = vmatmul.mubr.bf16.gmra.mrb[4].mxu1 %v982_v15 }
  0x2b   :  { %927 = vmatprep.mubr.bf16.mxu0 %v983_v16  ;;  %943 = vmatprep.mubr.bf16.mxu1 %v984_v17 }
  0x32   :  { %928 = vmatmul.mubr.bf16.gmra.mrb[8].mxu0 %v985_v18  ;;  %944 = vmatmul.mubr.bf16.gmra.mrb[8].mxu1 %v986_v19 }
  0x33   :  { %931 = vmatprep.mubr.bf16.mxu0 %v987_v20  ;;  %947 = vmatprep.mubr.bf16.mxu1 %v988_v21 }
  0x3a   :  { %932 = vmatmul.mubr.bf16.gmra.mrb[12].mxu0 %v989_v22  ;;  %948 = vmatmul.mubr.bf16.gmra.mrb[12].mxu1 %v990_v23 }
  0xf5   :  { %v921_v24 = vpop.f32.mrb[0].mxu0  ;;  %v937_v25 = vpop.f32.mrb[0].mxu1 }
  0xf6   :  { %v306_v26 = vpop.f32.mrb[1].mxu0  ;;  %v370_v27 = vpop.f32.mrb[1].mxu1 }
  0xf7   :  { %v922_v28 = vpop.f32.mrb[2].mxu0  ;;  %v938_v29 = vpop.f32.mrb[2].mxu1 }
  0xf8   :  { %v792_v30 = vpack.c.bf16 %v922_v28, %v921_v24  ;;  %v832_v31 = vpack.c.bf16 %v938_v29, %v937_v25  ;;  %v309_v32 = vpop.f32.mrb[3].mxu0  ;;  %v373_v33 = vpop.f32.mrb[3].mxu1 }
  0xf9   :  { %v787_v34 = vpack.c.bf16 %v309_v32, %v306_v26  ;;  %v827_v35 = vpack.c.bf16 %v373_v33, %v370_v27 }
  0xfa   :  { %864 = vst [vmem:[%s1128_s2 + $0x8] sm:$0xff] %v792_v30   ;;  %872 = vst [vmem:[%s1128_s2 + $0x48] sm:$0xff] %v832_v31  }
  0xfb   :  { %788 = vst [vmem:[%s1128_s2] sm:$0xff] %v787_v34   ;;  %871 = vst [vmem:[%s1128_s2 + $0x40] sm:$0xff] %v827_v35  }
  0xfd   :  { %v925_v36 = vpop.f32.mrb[4].mxu0  ;;  %v941_v37 = vpop.f32.mrb[4].mxu1 }
  0xfe   :  { %v322_v38 = vpop.f32.mrb[5].mxu0  ;;  %v386_v39 = vpop.f32.mrb[5].mxu1 }
  0xff   :  { %v926_v40 = vpop.f32.mrb[6].mxu0  ;;  %v942_v41 = vpop.f32.mrb[6].mxu1 }
 0x100   :  { %v802_v42 = vpack.c.bf16 %v926_v40, %v925_v36  ;;  %v842_v43 = vpack.c.bf16 %v942_v41, %v941_v37  ;;  %v325_v44 = vpop.f32.mrb[7].mxu0  ;;  %v389_v45 = vpop.f32.mrb[7].mxu1 }
 0x101   :  { %v797_v46 = vpack.c.bf16 %v325_v44, %v322_v38  ;;  %v837_v47 = vpack.c.bf16 %v389_v45, %v386_v39 }
 0x102   :  { %866 = vst [vmem:[%s1128_s2 + $0x18] sm:$0xff] %v802_v42   ;;  %874 = vst [vmem:[%s1128_s2 + $0x58] sm:$0xff] %v842_v43  }
 0x103   :  { %865 = vst [vmem:[%s1128_s2 + $0x10] sm:$0xff] %v797_v46   ;;  %873 = vst [vmem:[%s1128_s2 + $0x50] sm:$0xff] %v837_v47  }
 0x105   :  { %v929_v48 = vpop.f32.mrb[8].mxu0  ;;  %v945_v49 = vpop.f32.mrb[8].mxu1 }
 0x106   :  { %v338_v50 = vpop.f32.mrb[9].mxu0  ;;  %v402_v51 = vpop.f32.mrb[9].mxu1 }
 0x107   :  { %v930_v52 = vpop.f32.mrb[10].mxu0  ;;  %v946_v53 = vpop.f32.mrb[10].mxu1 }
 0x108   :  { %v812_v54 = vpack.c.bf16 %v930_v52, %v929_v48  ;;  %v852_v55 = vpack.c.bf16 %v946_v53, %v945_v49  ;;  %v341_v56 = vpop.f32.mrb[11].mxu0  ;;  %v405_v57 = vpop.f32.mrb[11].mxu1 }
 0x109   :  { %v807_v58 = vpack.c.bf16 %v341_v56, %v338_v50  ;;  %v847_v59 = vpack.c.bf16 %v405_v57, %v402_v51 }
 0x10a   :  { %868 = vst [vmem:[%s1128_s2 + $0x28] sm:$0xff] %v812_v54   ;;  %876 = vst [vmem:[%s1128_s2 + $0x68] sm:$0xff] %v852_v55  }
 0x10b   :  { %867 = vst [vmem:[%s1128_s2 + $0x20] sm:$0xff] %v807_v58   ;;  %875 = vst [vmem:[%s1128_s2 + $0x60] sm:$0xff] %v847_v59  }
 0x10d   :  { %v933_v60 = vpop.f32.mrb[12].mxu0  ;;  %v949_v61 = vpop.f32.mrb[12].mxu1 }
 0x10e   :  { %v354_v62 = vpop.f32.mrb[13].mxu0  ;;  %v418_v63 = vpop.f32.mrb[13].mxu1 }
 0x10f   :  { %v934_v0 = vpop.f32.mrb[14].mxu0  ;;  %v950_v1 = vpop.f32.mrb[14].mxu1 }
 0x110   :  { %v822_v2 = vpack.c.bf16 %v934_v0, %v933_v60  ;;  %v862_v3 = vpack.c.bf16 %v950_v1, %v949_v61  ;;  %v357_v4 = vpop.f32.mrb[15].mxu0  ;;  %v421_v5 = vpop.f32.mrb[15].mxu1 }
 0x111   :  { %v817_v6 = vpack.c.bf16 %v357_v4, %v354_v62  ;;  %v857_v7 = vpack.c.bf16 %v421_v5, %v418_v63 }
 0x112   :  { %870 = vst [vmem:[%s1128_s2 + $0x38] sm:$0xff] %v822_v2   ;;  %878 = vst [vmem:[%s1128_s2 + $0x78] sm:$0xff] %v862_v3  }
 0x113   :  { %869 = vst [vmem:[%s1128_s2 + $0x30] sm:$0xff] %v817_v6   ;;  %877 = vst [vmem:[%s1128_s2 + $0x70] sm:$0xff] %v857_v7  }

// kernel: csgcl_forward.5
= control target key start
LH: loop header
LB: loop body
LE: loop exit
PB: predicated region body
PF: predicated region fallthrough
CT: control target
= control target key end

     0   :  { %s1522_s1 = inlined_call_operand.vmem [shape: bf16[256,128], index: 1, kind: input, shape index: {}]   ;;  %s1523_s0 = inlined_call_operand.vmem [shape: bf16[256,256], index: 0, kind: input, shape index: {}]   ;;  %s1524_s2 = inlined_call_operand.vmem [shape: f32[1,128], index: 2, kind: input, shape index: {}]   ;;  %s1525_s3 = inlined_call_operand.vmem [shape: bf16[256,128], index: 3, kind: output, shape index: {}]  }
   0x1   :  { %v1209_v0 = vld [vmem:[%s1522_s1 + $0x40] sm:$0xff]   ;;  %v1211_v2 = vld [vmem:[%s1522_s1 + $0x48] sm:$0xff]   ;;  %v1213_v4 = vld [vmem:[%s1522_s1 + $0x50] sm:$0xff]  }
   0x2   :  { %v1210_v1 = vld [vmem:[%s1522_s1] sm:$0xff]   ;;  %1081 = vmatprep.subr.bf16.mxu0 %v1209_v0  ;;  %1193 = vmatprep.subr.bf16.mxu1 %v1209_v0  ;;  %v1212_v3 = vld [vmem:[%s1522_s1 + $0x8] sm:$0xff]   ;;  %v1214_v5 = vld [vmem:[%s1522_s1 + $0x10] sm:$0xff]  }
   0x3   :  { %1082 = vmatpush3.bf16.msra.mxu0 %v1210_v1  ;;  %1201 = vmatpush3.bf16.msra.mxu1 %v1210_v1  ;;  %v1215_v6 = vld [vmem:[%s1522_s1 + $0x58] sm:$0xff]   ;;  %v1217_v8 = vld [vmem:[%s1522_s1 + $0x60] sm:$0xff]   ;;  %v1219_v10 = vld [vmem:[%s1522_s1 + $0x68] sm:$0xff]  }
   0x4   :  { %1083 = vmatprep.subr.bf16.mxu0 %v1211_v2  ;;  %1194 = vmatprep.subr.bf16.mxu1 %v1211_v2  ;;  %v1216_v7 = vld [vmem:[%s1522_s1 + $0x18] sm:$0xff]   ;;  %v1218_v9 = vld [vmem:[%s1522_s1 + $0x20] sm:$0xff]   ;;  %v1220_v13 = vld [vmem:[%s1522_s1 + $0x28] sm:$0xff]  }
   0x5   :  { %v1227_v11 = vld [vmem:[%s1523_s0 + $0x4] ss:$8 sps:$4 sm:$0xff]   ;;  %v1221_v14 = vld [vmem:[%s1522_s1 + $0x70] sm:$0xff]   ;;  %v1223_v16 = vld [vmem:[%s1522_s1 + $0x78] sm:$0xff]  }
   0x6   :  { %v1230_v12 = vld [vmem:[%s1523_s0 + $0x84] ss:$8 sps:$4 sm:$0xff]   ;;  %447 = vmatprep.mubr.bf16.mxu0 %v1227_v11  ;;  %v1222_v15 = vld [vmem:[%s1522_s1 + $0x30] sm:$0xff]   ;;  %v1224_v17 = vld [vmem:[%s1522_s1 + $0x38] sm:$0xff]  }
   0x7   :  { %1084 = vmatpush3.bf16.msra.mxu0 %v1212_v3  ;;  %1202 = vmatpush3.bf16.msra.mxu1 %v1212_v3  ;;  %v1225_v18 = vld [vmem:[%s1523_s0] ss:$8 sps:$4 sm:$0xff]   ;;  %v1231_v20 = vld [vmem:[%s1523_s0 + $0x14] ss:$8 sps:$4 sm:$0xff]   ;;  %v1235_v22 = vld [vmem:[%s1523_s0 + $0x10] ss:$8 sps:$4 sm:$0xff]  }
   0x8   :  { %1085 = vmatprep.subr.bf16.mxu0 %v1213_v4  ;;  %1195 = vmatprep.subr.bf16.mxu1 %v1213_v4  ;;  %v1228_v19 = vld [vmem:[%s1523_s0 + $0x80] ss:$8 sps:$4 sm:$0xff]   ;;  %v1233_v21 = vld [vmem:[%s1523_s0 + $0x94] ss:$8 sps:$4 sm:$0xff]   ;;  %v1236_v23 = vld [vmem:[%s1523_s0 + $0x90] ss:$8 sps:$4 sm:$0xff]  }
   0x9   :  { %511 = vmatprep.mubr.bf16.mxu1 %v1230_v12  ;;  %v1237_v24 = vld [vmem:[%s1523_s0 + $0x24] ss:$8 sps:$4 sm:$0xff]   ;;  %v1241_v26 = vld [vmem:[%s1523_s0 + $0x20] ss:$8 sps:$4 sm:$0xff]   ;;  %v1243_v28 = vld [vmem:[%s1523_s0 + $0x34] ss:$8 sps:$4 sm:$0xff]  }
   0xa   :  { %v1239_v25 = vld [vmem:[%s1523_s0 + $0xa4] ss:$8 sps:$4 sm:$0xff]   ;;  %v1242_v27 = vld [vmem:[%s1523_s0 + $0xa0] ss:$8 sps:$4 sm:$0xff]   ;;  %v1245_v29 = vld [vmem:[%s1523_s0 + $0xb4] ss:$8 sps:$4 sm:$0xff]  }
   0xb   :  { %1086 = vmatpush3.bf16.msra.mxu0 %v1214_v5  ;;  %1203 = vmatpush3.bf16.msra.mxu1 %v1214_v5  ;;  %v1247_v30 = vld [vmem:[%s1523_s0 + $0x30] ss:$8 sps:$4 sm:$0xff]   ;;  %v1249_v32 = vld [vmem:[%s1523_s0 + $0x44] ss:$8 sps:$4 sm:$0xff]   ;;  %v1253_v34 = vld [vmem:[%s1523_s0 + $0x40] ss:$8 sps:$4 sm:$0xff]  }
   0xc   :  { %1087 = vmatprep.subr.bf16.mxu0 %v1215_v6  ;;  %1196 = vmatprep.subr.bf16.mxu1 %v1215_v6  ;;  %v1248_v31 = vld [vmem:[%s1523_s0 + $0xb0] ss:$8 sps:$4 sm:$0xff]   ;;  %v1251_v33 = vld [vmem:[%s1523_s0 + $0xc4] ss:$8 sps:$4 sm:$0xff]   ;;  %v1254_v35 = vld [vmem:[%s1523_s0 + $0xc0] ss:$8 sps:$4 sm:$0xff]  }
   0xd   :  { %v1255_v36 = vld [vmem:[%s1523_s0 + $0x54] ss:$8 sps:$4 sm:$0xff]   ;;  %v1259_v38 = vld [vmem:[%s1523_s0 + $0x50] ss:$8 sps:$4 sm:$0xff]   ;;  %v1261_v40 = vld [vmem:[%s1523_s0 + $0x64] ss:$8 sps:$4 sm:$0xff]  }
   0xe   :  { %v1257_v37 = vld [vmem:[%s1523_s0 + $0xd4] ss:$8 sps:$4 sm:$0xff]   ;;  %v1260_v39 = vld [vmem:[%s1523_s0 + $0xd0] ss:$8 sps:$4 sm:$0xff]   ;;  %v1263_v41 = vld [vmem:[%s1523_s0 + $0xe4] ss:$8 sps:$4 sm:$0xff]  }
   0xf   :  { %1088 = vmatpush3.bf16.msra.mxu0 %v1216_v7  ;;  %1204 = vmatpush3.bf16.msra.mxu1 %v1216_v7  ;;  %v1265_v42 = vld [vmem:[%s1523_s0 + $0x60] ss:$8 sps:$4 sm:$0xff]   ;;  %v1267_v44 = vld [vmem:[%s1523_s0 + $0x74] ss:$8 sps:$4 sm:$0xff]   ;;  %v1271_v46 = vld [vmem:[%s1523_s0 + $0x70] ss:$8 sps:$4 sm:$0xff]  }
  0x10   :  { %1089 = vmatprep.subr.bf16.mxu0 %v1217_v8  ;;  %1197 = vmatprep.subr.bf16.mxu1 %v1217_v8  ;;  %v1266_v43 = vld [vmem:[%s1523_s0 + $0xe0] ss:$8 sps:$4 sm:$0xff]   ;;  %v1269_v45 = vld [vmem:[%s1523_s0 + $0xf4] ss:$8 sps:$4 sm:$0xff]   ;;  %v1272_v47 = vld [vmem:[%s1523_s0 + $0xf0] ss:$8 sps:$4 sm:$0xff]  }
  0x11   :  { %v1440_v50 = vld [vmem:[%s1524_s2] ss:$0 sm:$0xff] }
  0x13   :  { %1090 = vmatpush3.bf16.msra.mxu0 %v1218_v9  ;;  %1205 = vmatpush3.bf16.msra.mxu1 %v1218_v9 }
  0x14   :  { %1091 = vmatprep.subr.bf16.mxu0 %v1219_v10  ;;  %1198 = vmatprep.subr.bf16.mxu1 %v1219_v10 }
  0x17   :  { %1092 = vmatpush3.bf16.msra.mxu0 %v1220_v13  ;;  %1206 = vmatpush3.bf16.msra.mxu1 %v1220_v13 }
  0x18   :  { %1093 = vmatprep.subr.bf16.mxu0 %v1221_v14  ;;  %1199 = vmatprep.subr.bf16.mxu1 %v1221_v14 }
  0x1b   :  { %1094 = vmatpush3.bf16.msra.mxu0 %v1222_v15  ;;  %1207 = vmatpush3.bf16.msra.mxu1 %v1222_v15 }
  0x1c   :  { %1095 = vmatprep.subr.bf16.mxu0 %v1223_v16  ;;  %1200 = vmatprep.subr.bf16.mxu1 %v1223_v16 }
  0x1f   :  { %1096 = vmatpush3.bf16.msra.mxu0 %v1224_v17  ;;  %1208 = vmatpush3.bf16.msra.mxu1 %v1224_v17 }
  0x22   :  { %448 = vmatmul.mubr.bf16.vlgmr.msra.gmra.mrb[0].mxu0 %v1225_v18  ;;  %512 = vmatmul.mubr.bf16.vlgmr.msra.gmra.mrb[0].mxu1 %v1228_v19 }
  0x23   :  { %455 = vmatprep.mubr.bf16.mxu0 %v1231_v20  ;;  %519 = vmatprep.mubr.bf16.mxu1 %v1233_v21 }
  0x2a   :  { %456 = vmatmul.mubr.bf16.gmra.mrb[4].mxu0 %v1235_v22  ;;  %520 = vmatmul.mubr.bf16.gmra.mrb[4].mxu1 %v1236_v23 }
  0x2b   :  { %463 = vmatprep.mubr.bf16.mxu0 %v1237_v24  ;;  %527 = vmatprep.mubr.bf16.mxu1 %v1239_v25 }
  0x32   :  { %464 = vmatmul.mubr.bf16.gmra.mrb[8].mxu0 %v1241_v26  ;;  %528 = vmatmul.mubr.bf16.gmra.mrb[8].mxu1 %v1242_v27 }
  0x33   :  { %471 = vmatprep.mubr.bf16.mxu0 %v1243_v28  ;;  %535 = vmatprep.mubr.bf16.mxu1 %v1245_v29 }
  0x3a   :  { %472 = vmatmul.mubr.bf16.gmra.mrb[12].mxu0 %v1247_v30  ;;  %536 = vmatmul.mubr.bf16.gmra.mrb[12].mxu1 %v1248_v31 }
  0x3b   :  { %479 = vmatprep.mubr.bf16.mxu0 %v1249_v32  ;;  %543 = vmatprep.mubr.bf16.mxu1 %v1251_v33 }
  0x42   :  { %480 = vmatmul.mubr.bf16.gmra.mrb[16].mxu0 %v1253_v34  ;;  %544 = vmatmul.mubr.bf16.gmra.mrb[16].mxu1 %v1254_v35 }
  0x43   :  { %487 = vmatprep.mubr.bf16.mxu0 %v1255_v36  ;;  %551 = vmatprep.mubr.bf16.mxu1 %v1257_v37 }
  0x4a   :  { %488 = vmatmul.mubr.bf16.gmra.mrb[20].mxu0 %v1259_v38  ;;  %552 = vmatmul.mubr.bf16.gmra.mrb[20].mxu1 %v1260_v39 }
  0x4b   :  { %495 = vmatprep.mubr.bf16.mxu0 %v1261_v40  ;;  %559 = vmatprep.mubr.bf16.mxu1 %v1263_v41 }
  0x52   :  { %496 = vmatmul.mubr.bf16.gmra.mrb[24].mxu0 %v1265_v42  ;;  %560 = vmatmul.mubr.bf16.gmra.mrb[24].mxu1 %v1266_v43 }
  0x53   :  { %503 = vmatprep.mubr.bf16.mxu0 %v1267_v44  ;;  %567 = vmatprep.mubr.bf16.mxu1 %v1269_v45 }
  0x5a   :  { %504 = vmatmul.mubr.bf16.gmra.mrb[28].mxu0 %v1271_v46  ;;  %568 = vmatmul.mubr.bf16.gmra.mrb[28].mxu1 %v1272_v47 }
  0xf5   :  { %v1097_v48 = vpop.f32.mrb[0].mxu0  ;;  %v1145_v49 = vpop.f32.mrb[0].mxu1 }
  0xf6   :  { %v1098_v51 = vpop.f32.mrb[1].mxu0  ;;  %v1146_v52 = vpop.f32.mrb[1].mxu1 }
  0xf7   :  { %v1099_v53 = vadd.f32 %v1098_v51, %v1097_v48  ;;  %v1147_v54 = vadd.f32 %v1146_v52, %v1145_v49  ;;  %v1100_v55 = vpop.f32.mrb[2].mxu0  ;;  %v1148_v56 = vpop.f32.mrb[2].mxu1 }
  0xf8   :  { %v1101_v57 = vpop.f32.mrb[3].mxu0  ;;  %v1149_v58 = vpop.f32.mrb[3].mxu1 }
  0xf9   :  { %v576_v59 = vadd.f32 %v1099_v53, %v1440_v50  ;;  %v592_v60 = vadd.f32 %v1147_v54, %v1440_v50  ;;  %v1102_v61 = vadd.f32 %v1101_v57, %v1100_v55  ;;  %v1150_v62 = vadd.f32 %v1149_v58, %v1148_v56 }
  0xfb   :  { %v577_v63 = vadd.f32 %v1102_v61, %v1440_v50  ;;  %v593_v0 = vadd.f32 %v1150_v62, %v1440_v50  ;;  %v675_v1 = vmax.f32 %v576_v59, 0.0  ;;  %v691_v2 = vmax.f32 %v592_v60, 0.0 }
  0xfd   :  { %v676_v3 = vmax.f32 %v577_v63, 0.0  ;;  %v692_v4 = vmax.f32 %v593_v0, 0.0  ;;  %v1103_v5 = vpop.f32.mrb[4].mxu0  ;;  %v1151_v6 = vpop.f32.mrb[4].mxu1 }
  0xfe   :  { %v1104_v7 = vpop.f32.mrb[5].mxu0  ;;  %v1152_v8 = vpop.f32.mrb[5].mxu1 }
  0xff   :  { %v989_v9 = vpack.c.bf16 %v676_v3, %v675_v1  ;;  %v1029_v10 = vpack.c.bf16 %v692_v4, %v691_v2  ;;  %v1105_v11 = vadd.f32 %v1104_v7, %v1103_v5  ;;  %v1153_v12 = vadd.f32 %v1152_v8, %v1151_v6  ;;  %v1106_v13 = vpop.f32.mrb[6].mxu0  ;;  %v1154_v14 = vpop.f32.mrb[6].mxu1 }
 0x100   :  { %v1107_v15 = vpop.f32.mrb[7].mxu0  ;;  %v1155_v16 = vpop.f32.mrb[7].mxu1 }
 0x101   :  { %990 = vst [vmem:[%s1525_s3] sm:$0xff] %v989_v9   ;;  %1073 = vst [vmem:[%s1525_s3 + $0x40] sm:$0xff] %v1029_v10   ;;  %v578_v17 = vadd.f32 %v1105_v11, %v1440_v50  ;;  %v594_v18 = vadd.f32 %v1153_v12, %v1440_v50  ;;  %v1108_v19 = vadd.f32 %v1107_v15, %v1106_v13 }
 0x102   :  { %v1156_v20 = vadd.f32 %v1155_v16, %v1154_v14 }
 0x103   :  { %v579_v21 = vadd.f32 %v1108_v19, %v1440_v50  ;;  %v677_v23 = vmax.f32 %v578_v17, 0.0  ;;  %v693_v24 = vmax.f32 %v594_v18, 0.0 }
 0x104   :  { %v595_v22 = vadd.f32 %v1156_v20, %v1440_v50 }
 0x105   :  { %v678_v25 = vmax.f32 %v579_v21, 0.0  ;;  %v1109_v27 = vpop.f32.mrb[8].mxu0  ;;  %v1157_v28 = vpop.f32.mrb[8].mxu1 }
 0x106   :  { %v694_v26 = vmax.f32 %v595_v22, 0.0  ;;  %v1110_v29 = vpop.f32.mrb[9].mxu0  ;;  %v1158_v30 = vpop.f32.mrb[9].mxu1 }
 0x107   :  { %v994_v31 = vpack.c.bf16 %v678_v25, %v677_v23  ;;  %v1111_v33 = vadd.f32 %v1110_v29, %v1109_v27  ;;  %v1159_v34 = vadd.f32 %v1158_v30, %v1157_v28  ;;  %v1112_v35 = vpop.f32.mrb[10].mxu0  ;;  %v1160_v36 = vpop.f32.mrb[10].mxu1 }
 0x108   :  { %v1034_v32 = vpack.c.bf16 %v694_v26, %v693_v24  ;;  %v1113_v37 = vpop.f32.mrb[11].mxu0  ;;  %v1161_v38 = vpop.f32.mrb[11].mxu1 }
 0x109   :  { %1066 = vst [vmem:[%s1525_s3 + $0x8] sm:$0xff] %v994_v31   ;;  %v580_v39 = vadd.f32 %v1111_v33, %v1440_v50  ;;  %v596_v40 = vadd.f32 %v1159_v34, %v1440_v50  ;;  %v1114_v41 = vadd.f32 %v1113_v37, %v1112_v35  ;;  %v1162_v42 = vadd.f32 %v1161_v38, %v1160_v36 }
 0x10a   :  { %1074 = vst [vmem:[%s1525_s3 + $0x48] sm:$0xff] %v1034_v32  }
 0x10b   :  { %v581_v43 = vadd.f32 %v1114_v41, %v1440_v50  ;;  %v597_v44 = vadd.f32 %v1162_v42, %v1440_v50  ;;  %v679_v45 = vmax.f32 %v580_v39, 0.0  ;;  %v695_v46 = vmax.f32 %v596_v40, 0.0 }
 0x10d   :  { %v680_v47 = vmax.f32 %v581_v43, 0.0  ;;  %v696_v48 = vmax.f32 %v597_v44, 0.0  ;;  %v1115_v49 = vpop.f32.mrb[12].mxu0  ;;  %v1163_v51 = vpop.f32.mrb[12].mxu1 }
 0x10e   :  { %v1116_v52 = vpop.f32.mrb[13].mxu0  ;;  %v1164_v53 = vpop.f32.mrb[13].mxu1 }
 0x10f   :  { %v999_v54 = vpack.c.bf16 %v680_v47, %v679_v45  ;;  %v1039_v55 = vpack.c.bf16 %v696_v48, %v695_v46  ;;  %v1117_v56 = vadd.f32 %v1116_v52, %v1115_v49  ;;  %v1165_v57 = vadd.f32 %v1164_v53, %v1163_v51  ;;  %v1118_v58 = vpop.f32.mrb[14].mxu0  ;;  %v1166_v59 = vpop.f32.mrb[14].mxu1 }
 0x110   :  { %v1119_v60 = vpop.f32.mrb[15].mxu0  ;;  %v1167_v61 = vpop.f32.mrb[15].mxu1 }
 0x111   :  { %1067 = vst [vmem:[%s1525_s3 + $0x10] sm:$0xff] %v999_v54   ;;  %1075 = vst [vmem:[%s1525_s3 + $0x50] sm:$0xff] %v1039_v55   ;;  %v582_v62 = vadd.f32 %v1117_v56, %v1440_v50  ;;  %v598_v63 = vadd.f32 %v1165_v57, %v1440_v50  ;;  %v1120_v0 = vadd.f32 %v1119_v60, %v1118_v58 }
 0x112   :  { %v1168_v1 = vadd.f32 %v1167_v61, %v1166_v59 }
 0x113   :  { %v583_v2 = vadd.f32 %v1120_v0, %v1440_v50  ;;  %v681_v4 = vmax.f32 %v582_v62, 0.0  ;;  %v697_v5 = vmax.f32 %v598_v63, 0.0 }
 0x114   :  { %v599_v3 = vadd.f32 %v1168_v1, %v1440_v50 }
 0x115   :  { %v682_v6 = vmax.f32 %v583_v2, 0.0  ;;  %v1121_v8 = vpop.f32.mrb[16].mxu0  ;;  %v1169_v9 = vpop.f32.mrb[16].mxu1 }
 0x116   :  { %v698_v7 = vmax.f32 %v599_v3, 0.0  ;;  %v1122_v10 = vpop.f32.mrb[17].mxu0  ;;  %v1170_v11 = vpop.f32.mrb[17].mxu1 }
 0x117   :  { %v1004_v12 = vpack.c.bf16 %v682_v6, %v681_v4  ;;  %v1123_v14 = vadd.f32 %v1122_v10, %v1121_v8  ;;  %v1171_v15 = vadd.f32 %v1170_v11, %v1169_v9  ;;  %v1124_v16 = vpop.f32.mrb[18].mxu0  ;;  %v1172_v17 = vpop.f32.mrb[18].mxu1 }
 0x118   :  { %v1044_v13 = vpack.c.bf16 %v698_v7, %v697_v5  ;;  %v1125_v18 = vpop.f32.mrb[19].mxu0  ;;  %v1173_v19 = vpop.f32.mrb[19].mxu1 }
 0x119   :  { %1068 = vst [vmem:[%s1525_s3 + $0x18] sm:$0xff] %v1004_v12   ;;  %v584_v20 = vadd.f32 %v1123_v14, %v1440_v50  ;;  %v600_v21 = vadd.f32 %v1171_v15, %v1440_v50  ;;  %v1126_v22 = vadd.f32 %v1125_v18, %v1124_v16  ;;  %v1174_v23 = vadd.f32 %v1173_v19, %v1172_v17 }
 0x11a   :  { %1076 = vst [vmem:[%s1525_s3 + $0x58] sm:$0xff] %v1044_v13  }
 0x11b   :  { %v585_v24 = vadd.f32 %v1126_v22, %v1440_v50  ;;  %v601_v25 = vadd.f32 %v1174_v23, %v1440_v50  ;;  %v683_v26 = vmax.f32 %v584_v20, 0.0  ;;  %v699_v27 = vmax.f32 %v600_v21, 0.0 }
 0x11d   :  { %v684_v28 = vmax.f32 %v585_v24, 0.0  ;;  %v700_v29 = vmax.f32 %v601_v25, 0.0  ;;  %v1127_v30 = vpop.f32.mrb[20].mxu0  ;;  %v1175_v31 = vpop.f32.mrb[20].mxu1 }
 0x11e   :  { %v1128_v32 = vpop.f32.mrb[21].mxu0  ;;  %v1176_v33 = vpop.f32.mrb[21].mxu1 }
 0x11f   :  { %v1009_v34 = vpack.c.bf16 %v684_v28, %v683_v26  ;;  %v1049_v35 = vpack.c.bf16 %v700_v29, %v699_v27  ;;  %v1129_v36 = vadd.f32 %v1128_v32, %v1127_v30  ;;  %v1177_v37 = vadd.f32 %v1176_v33, %v1175_v31  ;;  %v1130_v38 = vpop.f32.mrb[22].mxu0  ;;  %v1178_v39 = vpop.f32.mrb[22].mxu1 }
 0x120   :  { %v1131_v40 = vpop.f32.mrb[23].mxu0  ;;  %v1179_v41 = vpop.f32.mrb[23].mxu1 }
 0x121   :  { %1069 = vst [vmem:[%s1525_s3 + $0x20] sm:$0xff] %v1009_v34   ;;  %1077 = vst [vmem:[%s1525_s3 + $0x60] sm:$0xff] %v1049_v35   ;;  %v586_v42 = vadd.f32 %v1129_v36, %v1440_v50  ;;  %v602_v43 = vadd.f32 %v1177_v37, %v1440_v50  ;;  %v1132_v44 = vadd.f32 %v1131_v40, %v1130_v38 }
 0x122   :  { %v1180_v45 = vadd.f32 %v1179_v41, %v1178_v39 }
 0x123   :  { %v587_v46 = vadd.f32 %v1132_v44, %v1440_v50  ;;  %v685_v48 = vmax.f32 %v586_v42, 0.0  ;;  %v701_v49 = vmax.f32 %v602_v43, 0.0 }
 0x124   :  { %v603_v47 = vadd.f32 %v1180_v45, %v1440_v50 }
 0x125   :  { %v686_v51 = vmax.f32 %v587_v46, 0.0  ;;  %v1133_v53 = vpop.f32.mrb[24].mxu0  ;;  %v1181_v54 = vpop.f32.mrb[24].mxu1 }
 0x126   :  { %v702_v52 = vmax.f32 %v603_v47, 0.0  ;;  %v1134_v55 = vpop.f32.mrb[25].mxu0  ;;  %v1182_v56 = vpop.f32.mrb[25].mxu1 }
 0x127   :  { %v1014_v57 = vpack.c.bf16 %v686_v51, %v685_v48  ;;  %v1135_v59 = vadd.f32 %v1134_v55, %v1133_v53  ;;  %v1183_v60 = vadd.f32 %v1182_v56, %v1181_v54  ;;  %v1136_v61 = vpop.f32.mrb[26].mxu0  ;;  %v1184_v62 = vpop.f32.mrb[26].mxu1 }
 0x128   :  { %v1054_v58 = vpack.c.bf16 %v702_v52, %v701_v49  ;;  %v1137_v63 = vpop.f32.mrb[27].mxu0  ;;  %v1185_v0 = vpop.f32.mrb[27].mxu1 }
 0x129   :  { %1070 = vst [vmem:[%s1525_s3 + $0x28] sm:$0xff] %v1014_v57   ;;  %v588_v1 = vadd.f32 %v1135_v59, %v1440_v50  ;;  %v604_v2 = vadd.f32 %v1183_v60, %v1440_v50  ;;  %v1138_v3 = vadd.f32 %v1137_v63, %v1136_v61  ;;  %v1186_v4 = vadd.f32 %v1185_v0, %v1184_v62 }
 0x12a   :  { %1078 = vst [vmem:[%s1525_s3 + $0x68] sm:$0xff] %v1054_v58  }
 0x12b   :  { %v589_v5 = vadd.f32 %v1138_v3, %v1440_v50  ;;  %v605_v6 = vadd.f32 %v1186_v4, %v1440_v50  ;;  %v687_v7 = vmax.f32 %v588_v1, 0.0  ;;  %v703_v8 = vmax.f32 %v604_v2, 0.0 }
 0x12d   :  { %v688_v9 = vmax.f32 %v589_v5, 0.0  ;;  %v704_v10 = vmax.f32 %v605_v6, 0.0  ;;  %v1139_v11 = vpop.f32.mrb[28].mxu0  ;;  %v1187_v12 = vpop.f32.mrb[28].mxu1 }
 0x12e   :  { %v1140_v13 = vpop.f32.mrb[29].mxu0  ;;  %v1188_v14 = vpop.f32.mrb[29].mxu1 }
 0x12f   :  { %v1019_v15 = vpack.c.bf16 %v688_v9, %v687_v7  ;;  %v1059_v16 = vpack.c.bf16 %v704_v10, %v703_v8  ;;  %v1141_v17 = vadd.f32 %v1140_v13, %v1139_v11  ;;  %v1189_v18 = vadd.f32 %v1188_v14, %v1187_v12  ;;  %v1142_v19 = vpop.f32.mrb[30].mxu0  ;;  %v1190_v20 = vpop.f32.mrb[30].mxu1 }
 0x130   :  { %v1143_v21 = vpop.f32.mrb[31].mxu0  ;;  %v1191_v22 = vpop.f32.mrb[31].mxu1 }
 0x131   :  { %1071 = vst [vmem:[%s1525_s3 + $0x30] sm:$0xff] %v1019_v15   ;;  %1079 = vst [vmem:[%s1525_s3 + $0x70] sm:$0xff] %v1059_v16   ;;  %v590_v23 = vadd.f32 %v1141_v17, %v1440_v50  ;;  %v606_v24 = vadd.f32 %v1189_v18, %v1440_v50  ;;  %v1144_v25 = vadd.f32 %v1143_v21, %v1142_v19 }
 0x132   :  { %v1192_v26 = vadd.f32 %v1191_v22, %v1190_v20 }
 0x133   :  { %v591_v27 = vadd.f32 %v1144_v25, %v1440_v50  ;;  %v689_v29 = vmax.f32 %v590_v23, 0.0  ;;  %v705_v30 = vmax.f32 %v606_v24, 0.0 }
 0x134   :  { %v607_v28 = vadd.f32 %v1192_v26, %v1440_v50 }
 0x135   :  { %v690_v31 = vmax.f32 %v591_v27, 0.0 }
 0x136   :  { %v706_v32 = vmax.f32 %v607_v28, 0.0 }
 0x137   :  { %v1024_v33 = vpack.c.bf16 %v690_v31, %v689_v29 }
 0x138   :  { %v1064_v34 = vpack.c.bf16 %v706_v32, %v705_v30 }
 0x139   :  { %1072 = vst [vmem:[%s1525_s3 + $0x38] sm:$0xff] %v1024_v33  }
 0x13a   :  { %1080 = vst [vmem:[%s1525_s3 + $0x78] sm:$0xff] %v1064_v34  }

// kernel: csgcl_forward.7
= control target key start
LH: loop header
LB: loop body
LE: loop exit
PB: predicated region body
PF: predicated region fallthrough
CT: control target
= control target key end

     0   :  { %s1283_s1 = inlined_call_operand.vmem [shape: bf16[256,128], index: 1, kind: input, shape index: {}]   ;;  %s1284_s0 = inlined_call_operand.vmem [shape: bf16[256,256], index: 0, kind: input, shape index: {}]   ;;  %s1285_s2 = inlined_call_operand.vmem [shape: f32[1,128], index: 2, kind: input, shape index: {}]   ;;  %s1286_s3 = inlined_call_operand.vmem [shape: f32[256,128], index: 3, kind: output, shape index: {}]  }
   0x1   :  { %v922_v0 = vld [vmem:[%s1283_s1 + $0x40] sm:$0xff]   ;;  %v924_v2 = vld [vmem:[%s1283_s1 + $0x48] sm:$0xff]   ;;  %v926_v4 = vld [vmem:[%s1283_s1 + $0x50] sm:$0xff]  }
   0x2   :  { %v923_v1 = vld [vmem:[%s1283_s1] sm:$0xff]   ;;  %794 = vmatprep.subr.bf16.mxu0 %v922_v0  ;;  %906 = vmatprep.subr.bf16.mxu1 %v922_v0  ;;  %v925_v3 = vld [vmem:[%s1283_s1 + $0x8] sm:$0xff]   ;;  %v927_v5 = vld [vmem:[%s1283_s1 + $0x10] sm:$0xff]  }
   0x3   :  { %795 = vmatpush3.bf16.msra.mxu0 %v923_v1  ;;  %914 = vmatpush3.bf16.msra.mxu1 %v923_v1  ;;  %v928_v6 = vld [vmem:[%s1283_s1 + $0x58] sm:$0xff]   ;;  %v930_v8 = vld [vmem:[%s1283_s1 + $0x60] sm:$0xff]   ;;  %v932_v10 = vld [vmem:[%s1283_s1 + $0x68] sm:$0xff]  }
   0x4   :  { %796 = vmatprep.subr.bf16.mxu0 %v924_v2  ;;  %907 = vmatprep.subr.bf16.mxu1 %v924_v2  ;;  %v929_v7 = vld [vmem:[%s1283_s1 + $0x18] sm:$0xff]   ;;  %v931_v9 = vld [vmem:[%s1283_s1 + $0x20] sm:$0xff]   ;;  %v933_v13 = vld [vmem:[%s1283_s1 + $0x28] sm:$0xff]  }
   0x5   :  { %v940_v11 = vld [vmem:[%s1284_s0 + $0x4] ss:$8 sps:$4 sm:$0xff]   ;;  %v934_v14 = vld [vmem:[%s1283_s1 + $0x70] sm:$0xff]   ;;  %v936_v16 = vld [vmem:[%s1283_s1 + $0x78] sm:$0xff]  }
   0x6   :  { %v943_v12 = vld [vmem:[%s1284_s0 + $0x84] ss:$8 sps:$4 sm:$0xff]   ;;  %447 = vmatprep.mubr.bf16.mxu0 %v940_v11  ;;  %v935_v15 = vld [vmem:[%s1283_s1 + $0x30] sm:$0xff]   ;;  %v937_v17 = vld [vmem:[%s1283_s1 + $0x38] sm:$0xff]  }
   0x7   :  { %797 = vmatpush3.bf16.msra.mxu0 %v925_v3  ;;  %915 = vmatpush3.bf16.msra.mxu1 %v925_v3  ;;  %v938_v18 = vld [vmem:[%s1284_s0] ss:$8 sps:$4 sm:$0xff]   ;;  %v944_v20 = vld [vmem:[%s1284_s0 + $0x14] ss:$8 sps:$4 sm:$0xff]   ;;  %v948_v22 = vld [vmem:[%s1284_s0 + $0x10] ss:$8 sps:$4 sm:$0xff]  }
   0x8   :  { %798 = vmatprep.subr.bf16.mxu0 %v926_v4  ;;  %908 = vmatprep.subr.bf16.mxu1 %v926_v4  ;;  %v941_v19 = vld [vmem:[%s1284_s0 + $0x80] ss:$8 sps:$4 sm:$0xff]   ;;  %v946_v21 = vld [vmem:[%s1284_s0 + $0x94] ss:$8 sps:$4 sm:$0xff]   ;;  %v949_v23 = vld [vmem:[%s1284_s0 + $0x90] ss:$8 sps:$4 sm:$0xff]  }
   0x9   :  { %511 = vmatprep.mubr.bf16.mxu1 %v943_v12  ;;  %v950_v24 = vld [vmem:[%s1284_s0 + $0x24] ss:$8 sps:$4 sm:$0xff]   ;;  %v954_v26 = vld [vmem:[%s1284_s0 + $0x20] ss:$8 sps:$4 sm:$0xff]   ;;  %v956_v28 = vld [vmem:[%s1284_s0 + $0x34] ss:$8 sps:$4 sm:$0xff]  }
   0xa   :  { %v952_v25 = vld [vmem:[%s1284_s0 + $0xa4] ss:$8 sps:$4 sm:$0xff]   ;;  %v955_v27 = vld [vmem:[%s1284_s0 + $0xa0] ss:$8 sps:$4 sm:$0xff]   ;;  %v958_v29 = vld [vmem:[%s1284_s0 + $0xb4] ss:$8 sps:$4 sm:$0xff]  }
   0xb   :  { %799 = vmatpush3.bf16.msra.mxu0 %v927_v5  ;;  %916 = vmatpush3.bf16.msra.mxu1 %v927_v5  ;;  %v960_v30 = vld [vmem:[%s1284_s0 + $0x30] ss:$8 sps:$4 sm:$0xff]   ;;  %v962_v32 = vld [vmem:[%s1284_s0 + $0x44] ss:$8 sps:$4 sm:$0xff]   ;;  %v966_v34 = vld [vmem:[%s1284_s0 + $0x40] ss:$8 sps:$4 sm:$0xff]  }
   0xc   :  { %800 = vmatprep.subr.bf16.mxu0 %v928_v6  ;;  %909 = vmatprep.subr.bf16.mxu1 %v928_v6  ;;  %v961_v31 = vld [vmem:[%s1284_s0 + $0xb0] ss:$8 sps:$4 sm:$0xff]   ;;  %v964_v33 = vld [vmem:[%s1284_s0 + $0xc4] ss:$8 sps:$4 sm:$0xff]   ;;  %v967_v35 = vld [vmem:[%s1284_s0 + $0xc0] ss:$8 sps:$4 sm:$0xff]  }
   0xd   :  { %v968_v36 = vld [vmem:[%s1284_s0 + $0x54] ss:$8 sps:$4 sm:$0xff]   ;;  %v972_v38 = vld [vmem:[%s1284_s0 + $0x50] ss:$8 sps:$4 sm:$0xff]   ;;  %v974_v40 = vld [vmem:[%s1284_s0 + $0x64] ss:$8 sps:$4 sm:$0xff]  }
   0xe   :  { %v970_v37 = vld [vmem:[%s1284_s0 + $0xd4] ss:$8 sps:$4 sm:$0xff]   ;;  %v973_v39 = vld [vmem:[%s1284_s0 + $0xd0] ss:$8 sps:$4 sm:$0xff]   ;;  %v976_v41 = vld [vmem:[%s1284_s0 + $0xe4] ss:$8 sps:$4 sm:$0xff]  }
   0xf   :  { %801 = vmatpush3.bf16.msra.mxu0 %v929_v7  ;;  %917 = vmatpush3.bf16.msra.mxu1 %v929_v7  ;;  %v978_v42 = vld [vmem:[%s1284_s0 + $0x60] ss:$8 sps:$4 sm:$0xff]   ;;  %v980_v44 = vld [vmem:[%s1284_s0 + $0x74] ss:$8 sps:$4 sm:$0xff]   ;;  %v984_v46 = vld [vmem:[%s1284_s0 + $0x70] ss:$8 sps:$4 sm:$0xff]  }
  0x10   :  { %802 = vmatprep.subr.bf16.mxu0 %v930_v8  ;;  %910 = vmatprep.subr.bf16.mxu1 %v930_v8  ;;  %v979_v43 = vld [vmem:[%s1284_s0 + $0xe0] ss:$8 sps:$4 sm:$0xff]   ;;  %v982_v45 = vld [vmem:[%s1284_s0 + $0xf4] ss:$8 sps:$4 sm:$0xff]   ;;  %v985_v47 = vld [vmem:[%s1284_s0 + $0xf0] ss:$8 sps:$4 sm:$0xff]  }
  0x11   :  { %v1153_v50 = vld [vmem:[%s1285_s2] ss:$0 sm:$0xff] }
  0x13   :  { %803 = vmatpush3.bf16.msra.mxu0 %v931_v9  ;;  %918 = vmatpush3.bf16.msra.mxu1 %v931_v9 }
  0x14   :  { %804 = vmatprep.subr.bf16.mxu0 %v932_v10  ;;  %911 = vmatprep.subr.bf16.mxu1 %v932_v10 }
  0x17   :  { %805 = vmatpush3.bf16.msra.mxu0 %v933_v13  ;;  %919 = vmatpush3.bf16.msra.mxu1 %v933_v13 }
  0x18   :  { %806 = vmatprep.subr.bf16.mxu0 %v934_v14  ;;  %912 = vmatprep.subr.bf16.mxu1 %v934_v14 }
  0x1b   :  { %807 = vmatpush3.bf16.msra.mxu0 %v935_v15  ;;  %920 = vmatpush3.bf16.msra.mxu1 %v935_v15 }
  0x1c   :  { %808 = vmatprep.subr.bf16.mxu0 %v936_v16  ;;  %913 = vmatprep.subr.bf16.mxu1 %v936_v16 }
  0x1f   :  { %809 = vmatpush3.bf16.msra.mxu0 %v937_v17  ;;  %921 = vmatpush3.bf16.msra.mxu1 %v937_v17 }
  0x22   :  { %448 = vmatmul.mubr.bf16.vlgmr.msra.gmra.mrb[0].mxu0 %v938_v18  ;;  %512 = vmatmul.mubr.bf16.vlgmr.msra.gmra.mrb[0].mxu1 %v941_v19 }
  0x23   :  { %455 = vmatprep.mubr.bf16.mxu0 %v944_v20  ;;  %519 = vmatprep.mubr.bf16.mxu1 %v946_v21 }
  0x2a   :  { %456 = vmatmul.mubr.bf16.gmra.mrb[4].mxu0 %v948_v22  ;;  %520 = vmatmul.mubr.bf16.gmra.mrb[4].mxu1 %v949_v23 }
  0x2b   :  { %463 = vmatprep.mubr.bf16.mxu0 %v950_v24  ;;  %527 = vmatprep.mubr.bf16.mxu1 %v952_v25 }
  0x32   :  { %464 = vmatmul.mubr.bf16.gmra.mrb[8].mxu0 %v954_v26  ;;  %528 = vmatmul.mubr.bf16.gmra.mrb[8].mxu1 %v955_v27 }
  0x33   :  { %471 = vmatprep.mubr.bf16.mxu0 %v956_v28  ;;  %535 = vmatprep.mubr.bf16.mxu1 %v958_v29 }
  0x3a   :  { %472 = vmatmul.mubr.bf16.gmra.mrb[12].mxu0 %v960_v30  ;;  %536 = vmatmul.mubr.bf16.gmra.mrb[12].mxu1 %v961_v31 }
  0x3b   :  { %479 = vmatprep.mubr.bf16.mxu0 %v962_v32  ;;  %543 = vmatprep.mubr.bf16.mxu1 %v964_v33 }
  0x42   :  { %480 = vmatmul.mubr.bf16.gmra.mrb[16].mxu0 %v966_v34  ;;  %544 = vmatmul.mubr.bf16.gmra.mrb[16].mxu1 %v967_v35 }
  0x43   :  { %487 = vmatprep.mubr.bf16.mxu0 %v968_v36  ;;  %551 = vmatprep.mubr.bf16.mxu1 %v970_v37 }
  0x4a   :  { %488 = vmatmul.mubr.bf16.gmra.mrb[20].mxu0 %v972_v38  ;;  %552 = vmatmul.mubr.bf16.gmra.mrb[20].mxu1 %v973_v39 }
  0x4b   :  { %495 = vmatprep.mubr.bf16.mxu0 %v974_v40  ;;  %559 = vmatprep.mubr.bf16.mxu1 %v976_v41 }
  0x52   :  { %496 = vmatmul.mubr.bf16.gmra.mrb[24].mxu0 %v978_v42  ;;  %560 = vmatmul.mubr.bf16.gmra.mrb[24].mxu1 %v979_v43 }
  0x53   :  { %503 = vmatprep.mubr.bf16.mxu0 %v980_v44  ;;  %567 = vmatprep.mubr.bf16.mxu1 %v982_v45 }
  0x5a   :  { %504 = vmatmul.mubr.bf16.gmra.mrb[28].mxu0 %v984_v46  ;;  %568 = vmatmul.mubr.bf16.gmra.mrb[28].mxu1 %v985_v47 }
  0xf5   :  { %v810_v48 = vpop.f32.mrb[0].mxu0  ;;  %v858_v49 = vpop.f32.mrb[0].mxu1 }
  0xf6   :  { %v811_v51 = vpop.f32.mrb[1].mxu0  ;;  %v859_v52 = vpop.f32.mrb[1].mxu1 }
  0xf7   :  { %v812_v53 = vadd.f32 %v811_v51, %v810_v48  ;;  %v860_v54 = vadd.f32 %v859_v52, %v858_v49  ;;  %v813_v55 = vpop.f32.mrb[2].mxu0  ;;  %v861_v56 = vpop.f32.mrb[2].mxu1 }
  0xf8   :  { %v814_v57 = vpop.f32.mrb[3].mxu0  ;;  %v862_v58 = vpop.f32.mrb[3].mxu1 }
  0xf9   :  { %v576_v59 = vadd.f32 %v812_v53, %v1153_v50  ;;  %v592_v60 = vadd.f32 %v860_v54, %v1153_v50  ;;  %v815_v61 = vadd.f32 %v814_v57, %v813_v55  ;;  %v863_v62 = vadd.f32 %v862_v58, %v861_v56 }
  0xfb   :  { %v675_v63 = vmax.f32 %v576_v59, 0.0  ;;  %v691_v0 = vmax.f32 %v592_v60, 0.0  ;;  %v577_v1 = vadd.f32 %v815_v61, %v1153_v50  ;;  %v593_v2 = vadd.f32 %v863_v62, %v1153_v50 }
  0xfd   :  { %707 = vst [vmem:[%s1286_s3] sm:$0xff] %v675_v63  ;;  %723 = vst [vmem:[%s1286_s3 + $0x80] sm:$0xff] %v691_v0  ;;  %v676_v3 = vmax.f32 %v577_v1, 0.0  ;;  %v692_v4 = vmax.f32 %v593_v2, 0.0  ;;  %v816_v5 = vpop.f32.mrb[4].mxu0  ;;  %v864_v6 = vpop.f32.mrb[4].mxu1 }
  0xfe   :  { %v817_v7 = vpop.f32.mrb[5].mxu0  ;;  %v865_v8 = vpop.f32.mrb[5].mxu1 }
  0xff   :  { %708 = vst [vmem:[%s1286_s3 + $0x8] sm:$0xff] %v676_v3  ;;  %724 = vst [vmem:[%s1286_s3 + $0x88] sm:$0xff] %v692_v4  ;;  %v818_v9 = vadd.f32 %v817_v7, %v816_v5  ;;  %v866_v10 = vadd.f32 %v865_v8, %v864_v6  ;;  %v819_v11 = vpop.f32.mrb[6].mxu0  ;;  %v867_v12 = vpop.f32.mrb[6].mxu1 }
 0x100   :  { %v820_v13 = vpop.f32.mrb[7].mxu0  ;;  %v868_v14 = vpop.f32.mrb[7].mxu1 }
 0x101   :  { %v578_v15 = vadd.f32 %v818_v9, %v1153_v50  ;;  %v594_v16 = vadd.f32 %v866_v10, %v1153_v50  ;;  %v821_v17 = vadd.f32 %v820_v13, %v819_v11  ;;  %v869_v18 = vadd.f32 %v868_v14, %v867_v12 }
 0x103   :  { %v677_v19 = vmax.f32 %v578_v15, 0.0  ;;  %v693_v20 = vmax.f32 %v594_v16, 0.0  ;;  %v579_v21 = vadd.f32 %v821_v17, %v1153_v50  ;;  %v595_v22 = vadd.f32 %v869_v18, %v1153_v50 }
 0x105   :  { %709 = vst [vmem:[%s1286_s3 + $0x10] sm:$0xff] %v677_v19  ;;  %725 = vst [vmem:[%s1286_s3 + $0x90] sm:$0xff] %v693_v20  ;;  %v678_v23 = vmax.f32 %v579_v21, 0.0  ;;  %v694_v24 = vmax.f32 %v595_v22, 0.0  ;;  %v822_v25 = vpop.f32.mrb[8].mxu0  ;;  %v870_v26 = vpop.f32.mrb[8].mxu1 }
 0x106   :  { %v823_v27 = vpop.f32.mrb[9].mxu0  ;;  %v871_v28 = vpop.f32.mrb[9].mxu1 }
 0x107   :  { %710 = vst [vmem:[%s1286_s3 + $0x18] sm:$0xff] %v678_v23  ;;  %726 = vst [vmem:[%s1286_s3 + $0x98] sm:$0xff] %v694_v24  ;;  %v824_v29 = vadd.f32 %v823_v27, %v822_v25  ;;  %v872_v30 = vadd.f32 %v871_v28, %v870_v26  ;;  %v825_v31 = vpop.f32.mrb[10].mxu0  ;;  %v873_v32 = vpop.f32.mrb[10].mxu1 }
 0x108   :  { %v826_v33 = vpop.f32.mrb[11].mxu0  ;;  %v874_v34 = vpop.f32.mrb[11].mxu1 }
 0x109   :  { %v580_v35 = vadd.f32 %v824_v29, %v1153_v50  ;;  %v596_v36 = vadd.f32 %v872_v30, %v1153_v50  ;;  %v827_v37 = vadd.f32 %v826_v33, %v825_v31  ;;  %v875_v38 = vadd.f32 %v874_v34, %v873_v32 }
 0x10b   :  { %v679_v39 = vmax.f32 %v580_v35, 0.0  ;;  %v695_v40 = vmax.f32 %v596_v36, 0.0  ;;  %v581_v41 = vadd.f32 %v827_v37, %v1153_v50  ;;  %v597_v42 = vadd.f32 %v875_v38, %v1153_v50 }
 0x10d   :  { %711 = vst [vmem:[%s1286_s3 + $0x20] sm:$0xff] %v679_v39  ;;  %727 = vst [vmem:[%s1286_s3 + $0xa0] sm:$0xff] %v695_v40  ;;  %v680_v43 = vmax.f32 %v581_v41, 0.0  ;;  %v696_v44 = vmax.f32 %v597_v42, 0.0  ;;  %v828_v45 = vpop.f32.mrb[12].mxu0  ;;  %v876_v46 = vpop.f32.mrb[12].mxu1 }
 0x10e   :  { %v829_v47 = vpop.f32.mrb[13].mxu0  ;;  %v877_v48 = vpop.f32.mrb[13].mxu1 }
 0x10f   :  { %712 = vst [vmem:[%s1286_s3 + $0x28] sm:$0xff] %v680_v43  ;;  %728 = vst [vmem:[%s1286_s3 + $0xa8] sm:$0xff] %v696_v44  ;;  %v830_v49 = vadd.f32 %v829_v47, %v828_v45  ;;  %v878_v51 = vadd.f32 %v877_v48, %v876_v46  ;;  %v831_v52 = vpop.f32.mrb[14].mxu0  ;;  %v879_v53 = vpop.f32.mrb[14].mxu1 }
 0x110   :  { %v832_v54 = vpop.f32.mrb[15].mxu0  ;;  %v880_v55 = vpop.f32.mrb[15].mxu1 }
 0x111   :  { %v582_v56 = vadd.f32 %v830_v49, %v1153_v50  ;;  %v598_v57 = vadd.f32 %v878_v51, %v1153_v50  ;;  %v833_v58 = vadd.f32 %v832_v54, %v831_v52  ;;  %v881_v59 = vadd.f32 %v880_v55, %v879_v53 }
 0x113   :  { %v681_v60 = vmax.f32 %v582_v56, 0.0  ;;  %v697_v61 = vmax.f32 %v598_v57, 0.0  ;;  %v583_v62 = vadd.f32 %v833_v58, %v1153_v50  ;;  %v599_v63 = vadd.f32 %v881_v59, %v1153_v50 }
 0x115   :  { %713 = vst [vmem:[%s1286_s3 + $0x30] sm:$0xff] %v681_v60  ;;  %729 = vst [vmem:[%s1286_s3 + $0xb0] sm:$0xff] %v697_v61  ;;  %v682_v0 = vmax.f32 %v583_v62, 0.0  ;;  %v698_v1 = vmax.f32 %v599_v63, 0.0  ;;  %v834_v2 = vpop.f32.mrb[16].mxu0  ;;  %v882_v3 = vpop.f32.mrb[16].mxu1 }
 0x116   :  { %v835_v4 = vpop.f32.mrb[17].mxu0  ;;  %v883_v5 = vpop.f32.mrb[17].mxu1 }
 0x117   :  { %714 = vst [vmem:[%s1286_s3 + $0x38] sm:$0xff] %v682_v0  ;;  %730 = vst [vmem:[%s1286_s3 + $0xb8] sm:$0xff] %v698_v1  ;;  %v836_v6 = vadd.f32 %v835_v4, %v834_v2  ;;  %v884_v7 = vadd.f32 %v883_v5, %v882_v3  ;;  %v837_v8 = vpop.f32.mrb[18].mxu0  ;;  %v885_v9 = vpop.f32.mrb[18].mxu1 }
 0x118   :  { %v838_v10 = vpop.f32.mrb[19].mxu0  ;;  %v886_v11 = vpop.f32.mrb[19].mxu1 }
 0x119   :  { %v584_v12 = vadd.f32 %v836_v6, %v1153_v50  ;;  %v600_v13 = vadd.f32 %v884_v7, %v1153_v50  ;;  %v839_v14 = vadd.f32 %v838_v10, %v837_v8  ;;  %v887_v15 = vadd.f32 %v886_v11, %v885_v9 }
 0x11b   :  { %v683_v16 = vmax.f32 %v584_v12, 0.0  ;;  %v699_v17 = vmax.f32 %v600_v13, 0.0  ;;  %v585_v18 = vadd.f32 %v839_v14, %v1153_v50  ;;  %v601_v19 = vadd.f32 %v887_v15, %v1153_v50 }
 0x11d   :  { %715 = vst [vmem:[%s1286_s3 + $0x40] sm:$0xff] %v683_v16  ;;  %731 = vst [vmem:[%s1286_s3 + $0xc0] sm:$0xff] %v699_v17  ;;  %v684_v20 = vmax.f32 %v585_v18, 0.0  ;;  %v700_v21 = vmax.f32 %v601_v19, 0.0  ;;  %v840_v22 = vpop.f32.mrb[20].mxu0  ;;  %v888_v23 = vpop.f32.mrb[20].mxu1 }
 0x11e   :  { %v841_v24 = vpop.f32.mrb[21].mxu0  ;;  %v889_v25 = vpop.f32.mrb[21].mxu1 }
 0x11f   :  { %716 = vst [vmem:[%s1286_s3 + $0x48] sm:$0xff] %v684_v20  ;;  %732 = vst [vmem:[%s1286_s3 + $0xc8] sm:$0xff] %v700_v21  ;;  %v842_v26 = vadd.f32 %v841_v24, %v840_v22  ;;  %v890_v27 = vadd.f32 %v889_v25, %v888_v23  ;;  %v843_v28 = vpop.f32.mrb[22].mxu0  ;;  %v891_v29 = vpop.f32.mrb[22].mxu1 }
 0x120   :  { %v844_v30 = vpop.f32.mrb[23].mxu0  ;;  %v892_v31 = vpop.f32.mrb[23].mxu1 }
 0x121   :  { %v586_v32 = vadd.f32 %v842_v26, %v1153_v50  ;;  %v602_v33 = vadd.f32 %v890_v27, %v1153_v50  ;;  %v845_v34 = vadd.f32 %v844_v30, %v843_v28  ;;  %v893_v35 = vadd.f32 %v892_v31, %v891_v29 }
 0x123   :  { %v685_v36 = vmax.f32 %v586_v32, 0.0  ;;  %v701_v37 = vmax.f32 %v602_v33, 0.0  ;;  %v587_v38 = vadd.f32 %v845_v34, %v1153_v50  ;;  %v603_v39 = vadd.f32 %v893_v35, %v1153_v50 }
 0x125   :  { %717 = vst [vmem:[%s1286_s3 + $0x50] sm:$0xff] %v685_v36  ;;  %733 = vst [vmem:[%s1286_s3 + $0xd0] sm:$0xff] %v701_v37  ;;  %v686_v40 = vmax.f32 %v587_v38, 0.0  ;;  %v702_v41 = vmax.f32 %v603_v39, 0.0  ;;  %v846_v42 = vpop.f32.mrb[24].mxu0  ;;  %v894_v43 = vpop.f32.mrb[24].mxu1 }
 0x126   :  { %v847_v44 = vpop.f32.mrb[25].mxu0  ;;  %v895_v45 = vpop.f32.mrb[25].mxu1 }
 0x127   :  { %718 = vst [vmem:[%s1286_s3 + $0x58] sm:$0xff] %v686_v40  ;;  %734 = vst [vmem:[%s1286_s3 + $0xd8] sm:$0xff] %v702_v41  ;;  %v848_v46 = vadd.f32 %v847_v44, %v846_v42  ;;  %v896_v47 = vadd.f32 %v895_v45, %v894_v43  ;;  %v849_v48 = vpop.f32.mrb[26].mxu0  ;;  %v897_v49 = vpop.f32.mrb[26].mxu1 }
 0x128   :  { %v850_v51 = vpop.f32.mrb[27].mxu0  ;;  %v898_v52 = vpop.f32.mrb[27].mxu1 }
 0x129   :  { %v588_v53 = vadd.f32 %v848_v46, %v1153_v50  ;;  %v604_v54 = vadd.f32 %v896_v47, %v1153_v50  ;;  %v851_v55 = vadd.f32 %v850_v51, %v849_v48  ;;  %v899_v56 = vadd.f32 %v898_v52, %v897_v49 }
 0x12b   :  { %v687_v57 = vmax.f32 %v588_v53, 0.0  ;;  %v703_v58 = vmax.f32 %v604_v54, 0.0  ;;  %v589_v59 = vadd.f32 %v851_v55, %v1153_v50  ;;  %v605_v60 = vadd.f32 %v899_v56, %v1153_v50 }
 0x12d   :  { %719 = vst [vmem:[%s1286_s3 + $0x60] sm:$0xff] %v687_v57  ;;  %735 = vst [vmem:[%s1286_s3 + $0xe0] sm:$0xff] %v703_v58  ;;  %v688_v61 = vmax.f32 %v589_v59, 0.0  ;;  %v704_v62 = vmax.f32 %v605_v60, 0.0  ;;  %v852_v63 = vpop.f32.mrb[28].mxu0  ;;  %v900_v0 = vpop.f32.mrb[28].mxu1 }
 0x12e   :  { %v853_v1 = vpop.f32.mrb[29].mxu0  ;;  %v901_v2 = vpop.f32.mrb[29].mxu1 }
 0x12f   :  { %720 = vst [vmem:[%s1286_s3 + $0x68] sm:$0xff] %v688_v61  ;;  %736 = vst [vmem:[%s1286_s3 + $0xe8] sm:$0xff] %v704_v62  ;;  %v854_v3 = vadd.f32 %v853_v1, %v852_v63  ;;  %v902_v4 = vadd.f32 %v901_v2, %v900_v0  ;;  %v855_v5 = vpop.f32.mrb[30].mxu0  ;;  %v903_v6 = vpop.f32.mrb[30].mxu1 }
 0x130   :  { %v856_v7 = vpop.f32.mrb[31].mxu0  ;;  %v904_v8 = vpop.f32.mrb[31].mxu1 }
 0x131   :  { %v590_v9 = vadd.f32 %v854_v3, %v1153_v50  ;;  %v606_v10 = vadd.f32 %v902_v4, %v1153_v50  ;;  %v857_v11 = vadd.f32 %v856_v7, %v855_v5  ;;  %v905_v12 = vadd.f32 %v904_v8, %v903_v6 }
 0x133   :  { %v689_v13 = vmax.f32 %v590_v9, 0.0  ;;  %v705_v14 = vmax.f32 %v606_v10, 0.0  ;;  %v591_v15 = vadd.f32 %v857_v11, %v1153_v50  ;;  %v607_v16 = vadd.f32 %v905_v12, %v1153_v50 }
 0x135   :  { %721 = vst [vmem:[%s1286_s3 + $0x70] sm:$0xff] %v689_v13  ;;  %737 = vst [vmem:[%s1286_s3 + $0xf0] sm:$0xff] %v705_v14  ;;  %v690_v17 = vmax.f32 %v591_v15, 0.0  ;;  %v706_v18 = vmax.f32 %v607_v16, 0.0 }
 0x137   :  { %722 = vst [vmem:[%s1286_s3 + $0x78] sm:$0xff] %v690_v17  ;;  %738 = vst [vmem:[%s1286_s3 + $0xf8] sm:$0xff] %v706_v18 }

</bundles_post_ra>
